<compile_context>
chip_gen: v5e
topology: v5e:2x2
jax: 0.10.0
libtpu: 0.0.40
codegen_flags: <defaults>
</compile_context>

<pallas_src>
import functools

import jax
import jax.numpy as jnp
from jax.experimental import pallas as pl
from jax.experimental.pallas import tpu as pltpu

EPS = 1e-5                       # PyTorch BatchNorm2d default eps
LANE = 128                       # pad all channel dims to the TPU lane width
_VMEM_LIMIT = 32 * 1024 * 1024   # explicit scoped-VMEM budget; tiles fit v5e/v6e/v7x


def _round_up(x, m):
    return ((x + m - 1) // m) * m


def _pad2(a, shape):
    return jnp.pad(a, ((0, shape[0] - a.shape[0]), (0, shape[1] - a.shape[1])))


def _pad_row(v, size):
    return jnp.pad(v.astype(jnp.float32), (0, size - v.shape[0])).reshape(1, size)


# --------------------------- kernel 1: bn1/select/relu/conv1 ---------------------------
def _stage1_kernel(x_ref, s1_ref, b1_ref, w1_ref, y1_ref, part_ref, *,
                   rows_total, block_rows):
    h = jnp.maximum(x_ref[...] * s1_ref[...] + b1_ref[...], 0.0)        # f32 elementwise
    if rows_total % block_rows != 0:
        # mask rows of the ragged final tile so the bn2 partial sums stay exact
        row = (jax.lax.broadcasted_iota(jnp.int32, (block_rows, 1), 0)
               + pl.program_id(0) * block_rows)
        h = jnp.where(row < rows_total, h, 0.0)
    y = jnp.dot(h.astype(jnp.bfloat16), w1_ref[...],
                preferred_element_type=jnp.float32)
    y1_ref[...] = y
    part_ref[0] = jnp.concatenate(
        [jnp.sum(y, axis=0, keepdims=True),
         jnp.sum(y * y, axis=0, keepdims=True)], axis=0)


# ------------------- kernel 2: bn2/relu + 3x3/stride conv (9 shifted matmuls) ----------
def _make_stage2_kernel(stride, Ho, Wo, C1p, C2p, plane_hw):
    # parity (space-to-depth) decomposition: every 3x3 tap becomes an UNSTRIDED shifted
    # slice of one parity plane, so no strided VMEM access is needed inside the kernel.
    parities = [(pa, pb) for pa in range(stride) for pb in range(stride)]
    taps_by_plane = {p: [] for p in range(len(parities))}
    for ky in range(3):
        for kx in range(3):
            a, b = ky - 1, kx - 1
            p = parities.index((a % stride, b % stride))
            taps_by_plane[p].append((ky * 3 + kx, a // stride, b // stride))
    n_planes = len(parities)

    def kernel(*refs):
        plane_refs = refs[:n_planes]
        s2_ref, b2_ref, w2_ref = refs[n_planes:n_planes + 3]
        y2_ref, part_ref = refs[n_planes + 3:n_planes + 5]
        z_ref = refs[n_planes + 5]

        acc = jnp.zeros((Ho * Wo, C2p), jnp.float32)
        for p in range(n_planes):
            hp, wp = plane_hw[p]
            # bn2 -> relu on this parity plane, placed inside a zero halo (conv2 pad=1)
            hplane = jnp.maximum(plane_refs[p][0] * s2_ref[...] + b2_ref[...], 0.0)
            z_ref[...] = jnp.zeros_like(z_ref)
            z_ref[1:1 + hp, 1:1 + wp, :] = hplane
            for (t, oa, ob) in taps_by_plane[p]:
                tap = z_ref[1 + oa:1 + oa + Ho, 1 + ob:1 + ob + Wo, :]
                acc = acc + jnp.dot(
                    tap.reshape(Ho * Wo, C1p).astype(jnp.bfloat16), w2_ref[t],
                    preferred_element_type=jnp.float32)
        y2_ref[0] = acc.reshape(Ho, Wo, C2p)
        part_ref[0] = jnp.concatenate(
            [jnp.sum(acc, axis=0, keepdims=True),
             jnp.sum(acc * acc, axis=0, keepdims=True)], axis=0)

    return kernel


# ---------------- kernel 3: bn3/relu/conv3 fused with the residual path ----------------
def _stage3_kernel(y2_ref, xs_ref, s3_ref, b3_ref, w_ref, out_ref, *, identity):
    h = jnp.maximum(y2_ref[...] * s3_ref[...] + b3_ref[...], 0.0).astype(jnp.bfloat16)
    if identity:
        out_ref[...] = (jnp.dot(h, w_ref[...], preferred_element_type=jnp.float32)
                        + xs_ref[...])                       # identity residual, f32 add
    else:
        # conv3 and the 1x1 downsample share one matmul via a stacked contraction dim
        lhs = jnp.concatenate([h, xs_ref[...].astype(jnp.bfloat16)], axis=-1)
        out_ref[...] = jnp.dot(lhs, w_ref[...], preferred_element_type=jnp.float32)


# ------------------------------------ wrapper ------------------------------------------
def init_bottleneck_params(key, inplanes, planes, cfg, stride, expansion=4):
    """Deterministic synthetic parameters with the same shapes as the PyTorch module."""
    outplanes = planes * expansion
    k1, k2, k3, kd = jax.random.split(key, 4)

    def conv_w(k, co, ci, kh, kw):          # torch conv weight layout (Cout, Cin, kh, kw)
        fan_in = ci * kh * kw
        return jax.random.normal(k, (co, ci, kh, kw), jnp.float32) / jnp.sqrt(fan_in)

    return dict(
        bn1_gamma=jnp.ones((inplanes,), jnp.float32),
        bn1_beta=jnp.zeros((inplanes,), jnp.float32),
        select_indexes=jnp.ones((inplanes,), jnp.float32),   # ChannelSelection init
        conv1_w=conv_w(k1, cfg[1], cfg[0], 1, 1),
        bn2_gamma=jnp.ones((cfg[1],), jnp.float32),
        bn2_beta=jnp.zeros((cfg[1],), jnp.float32),
        conv2_w=conv_w(k2, cfg[2], cfg[1], 3, 3),
        bn3_gamma=jnp.ones((cfg[2],), jnp.float32),
        bn3_beta=jnp.zeros((cfg[2],), jnp.float32),
        conv3_w=conv_w(k3, outplanes, cfg[2], 1, 1),
        downsample_w=(conv_w(kd, outplanes, inplanes, 1, 1)
                      if (stride != 1 or inplanes != outplanes) else None),
    )


def bottleneck_forward(x_nchw, params, *, stride, block_rows=1024):
    x = jnp.transpose(x_nchw, (0, 2, 3, 1)).astype(jnp.float32)      # NCHW -> NHWC
    N, H, W, Cin = x.shape
    C1 = params['conv1_w'].shape[0]
    C2 = params['conv2_w'].shape[0]
    Cout = params['conv3_w'].shape[0]
    Cinp, C1p, C2p, Coutp = (_round_up(c, LANE) for c in (Cin, C1, C2, Cout))
    block_rows = _round_up(block_rows, 8)

    # pad channels once so every kernel operand / store is lane-dense
    xp = jnp.pad(x, ((0, 0), (0, 0), (0, 0), (0, Cinp - Cin)))
    M = N * H * W
    xf = xp.reshape(M, Cinp)

    # bn1 batch stats (training mode, biased var) folded with the ChannelSelection mask
    mu1 = jnp.mean(xf, axis=0, keepdims=True)
    var1 = jnp.maximum(jnp.mean(xf * xf, axis=0, keepdims=True) - mu1 * mu1, 0.0)
    rs1 = jax.lax.rsqrt(var1 + EPS)
    g1 = _pad_row(params['bn1_gamma'], Cinp)
    b1 = _pad_row(params['bn1_beta'], Cinp)
    sel = _pad_row(params['select_indexes'], Cinp)
    # TODO(synk): ChannelSelection drops channels whose index is 0 (shape change); it is
    # modeled here as an elementwise channel mask, exact for the default all-ones indexes.
    scale1 = sel * g1 * rs1
    shift1 = sel * (b1 - mu1 * g1 * rs1)
    w1p = _pad2(params['conv1_w'][:, :, 0, 0].T, (Cinp, C1p)).astype(jnp.bfloat16)

    # ---- kernel 1: tiled over rows, pipelined, emits bn2 sum/sum^2 partials ----
    tm = min(block_rows, max(8, _round_up(M, 8)))
    steps1 = pl.cdiv(M, tm)
    y1, part1 = pl.pallas_call(
        functools.partial(_stage1_kernel, rows_total=M, block_rows=tm),
        grid=(steps1,),
        in_specs=[pl.BlockSpec((tm, Cinp), lambda i: (i, 0)),
                  pl.BlockSpec((1, Cinp), lambda i: (0, 0)),
                  pl.BlockSpec((1, Cinp), lambda i: (0, 0)),
                  pl.BlockSpec((Cinp, C1p), lambda i: (0, 0))],
        out_specs=[pl.BlockSpec((tm, C1p), lambda i: (i, 0)),
                   pl.BlockSpec((1, 2, C1p), lambda i: (i, 0, 0))],
        out_shape=(jax.ShapeDtypeStruct((M, C1p), jnp.float32),
                   jax.ShapeDtypeStruct((steps1, 2, C1p), jnp.float32)),
        compiler_params=pltpu.CompilerParams(
            dimension_semantics=("parallel",), vmem_limit_bytes=_VMEM_LIMIT),
    )(xf, scale1, shift1, w1p)

    # bn2 scale/shift from the kernel-1 partials (no extra full pass over y1)
    tot1 = jnp.sum(part1, axis=0)
    mu2 = (tot1[0] / M).reshape(1, C1p)
    var2 = jnp.maximum((tot1[1] / M).reshape(1, C1p) - mu2 * mu2, 0.0)
    scale2 = _pad_row(params['bn2_gamma'], C1p) * jax.lax.rsqrt(var2 + EPS)
    shift2 = _pad_row(params['bn2_beta'], C1p) - mu2 * scale2

    # conv2: parity split of y1 so every 3x3 tap is an unstrided slice in the kernel
    Ho = (H - 1) // stride + 1
    Wo = (W - 1) // stride + 1
    y1_nhwc = y1.reshape(N, H, W, C1p)
    planes, plane_hw = [], []
    for pa in range(stride):
        for pb in range(stride):
            pln = y1_nhwc[:, pa::stride, pb::stride, :]
            planes.append(pln)
            plane_hw.append((pln.shape[1], pln.shape[2]))
    w2_taps = jnp.stack(
        [_pad2(params['conv2_w'][:, :, ky, kx].T, (C1p, C2p))
         for ky in range(3) for kx in range(3)], axis=0).astype(jnp.bfloat16)

    kern2 = _make_stage2_kernel(stride, Ho, Wo, C1p, C2p, tuple(plane_hw))
    in_specs2 = [pl.BlockSpec((1, hp, wp, C1p), lambda n: (n, 0, 0, 0))
                 for (hp, wp) in plane_hw]
    in_specs2 += [pl.BlockSpec((1, C1p), lambda n: (0, 0)),
                  pl.BlockSpec((1, C1p), lambda n: (0, 0)),
                  pl.BlockSpec((9, C1p, C2p), lambda n: (0, 0, 0))]
    y2, part2 = pl.pallas_call(
        kern2,
        grid=(N,),
        in_specs=in_specs2,
        out_specs=[pl.BlockSpec((1, Ho, Wo, C2p), lambda n: (n, 0, 0, 0)),
                   pl.BlockSpec((1, 2, C2p), lambda n: (n, 0, 0))],
        out_shape=(jax.ShapeDtypeStruct((N, Ho, Wo, C2p), jnp.float32),
                   jax.ShapeDtypeStruct((N, 2, C2p), jnp.float32)),
        scratch_shapes=[pltpu.VMEM((Ho + 2, Wo + 2, C1p), jnp.float32)],
        compiler_params=pltpu.CompilerParams(
            dimension_semantics=("parallel",), vmem_limit_bytes=_VMEM_LIMIT),
    )(*planes, scale2, shift2, w2_taps)

    # bn3 scale/shift from kernel-2 partials
    Mo = N * Ho * Wo
    tot2 = jnp.sum(part2, axis=0)
    mu3 = (tot2[0] / Mo).reshape(1, C2p)
    var3 = jnp.maximum((tot2[1] / Mo).reshape(1, C2p) - mu3 * mu3, 0.0)
    scale3 = _pad_row(params['bn3_gamma'], C2p) * jax.lax.rsqrt(var3 + EPS)
    shift3 = _pad_row(params['bn3_beta'], C2p) - mu3 * scale3

    # ---- kernel 3: bn3/relu/conv3 + residual, tiled over rows ----
    w3p = _pad2(params['conv3_w'][:, :, 0, 0].T, (C2p, Coutp)).astype(jnp.bfloat16)
    identity = params['downsample_w'] is None
    if identity:
        xs = xf                       # identity branch implies stride==1 and Cin==Cout
        w_last = w3p
    else:
        xs = xp[:, ::stride, ::stride, :].reshape(Mo, Cinp)
        wdp = _pad2(params['downsample_w'][:, :, 0, 0].T,
                    (Cinp, Coutp)).astype(jnp.bfloat16)
        w_last = jnp.concatenate([w3p, wdp], axis=0)          # stacked contraction dim

    y2f = y2.reshape(Mo, C2p)
    tm3 = min(block_rows, max(8, _round_up(Mo, 8)))
    out = pl.pallas_call(
        functools.partial(_stage3_kernel, identity=identity),
        grid=(pl.cdiv(Mo, tm3),),
        in_specs=[pl.BlockSpec((tm3, C2p), lambda i: (i, 0)),
                  pl.BlockSpec((tm3, xs.shape[1]), lambda i: (i, 0)),
                  pl.BlockSpec((1, C2p), lambda i: (0, 0)),
                  pl.BlockSpec((1, C2p), lambda i: (0, 0)),
                  pl.BlockSpec(w_last.shape, lambda i: (0, 0))],
        out_specs=pl.BlockSpec((tm3, Coutp), lambda i: (i, 0)),
        out_shape=jax.ShapeDtypeStruct((Mo, Coutp), jnp.float32),
        compiler_params=pltpu.CompilerParams(
            dimension_semantics=("parallel",), vmem_limit_bytes=_VMEM_LIMIT),
    )(y2f, xs, scale3, shift3, w_last)

    out = out.reshape(N, Ho, Wo, Coutp)[..., :Cout]
    return jnp.transpose(out, (0, 3, 1, 2))                   # NHWC -> NCHW


if __name__ == "__main__":
    key = jax.random.PRNGKey(0)
    k_x1, k_p1, k_x2, k_p2 = jax.random.split(key, 4)

    # Config A: stride-2 block with a 1x1/stride-2 downsample conv on the residual path.
    inplanes, planes, stride = 16, 8, 2
    cfg = [inplanes, planes, planes]
    x_a = jax.random.normal(k_x1, (2, inplanes, 16, 16), jnp.float32)   # NCHW like torch
    p_a = init_bottleneck_params(k_p1, inplanes, planes, cfg, stride)
    fwd_a = jax.jit(functools.partial(bottleneck_forward, stride=stride, block_rows=128))
    out_a = jax.block_until_ready(fwd_a(x_a, p_a))
    assert out_a.shape == (2, planes * 4, 8, 8), out_a.shape
    assert bool(jnp.all(jnp.isfinite(out_a)))

    # Config B: stride-1 block with identity residual (inplanes == planes*expansion).
    inplanes_b, planes_b, stride_b = 32, 8, 1
    cfg_b = [inplanes_b, planes_b, planes_b]
    x_b = jax.random.normal(k_x2, (2, inplanes_b, 16, 16), jnp.float32)
    p_b = init_bottleneck_params(k_p2, inplanes_b, planes_b, cfg_b, stride_b)
    fwd_b = jax.jit(functools.partial(bottleneck_forward, stride=stride_b, block_rows=128))
    out_b = jax.block_until_ready(fwd_b(x_b, p_b))
    assert out_b.shape == (2, planes_b * 4, 16, 16), out_b.shape
    assert bool(jnp.all(jnp.isfinite(out_b)))

    print("KERNEL_OK")
</pallas_src>

<mosaic_0001>
module attributes {stable_mosaic.version = 11 : i64} {
  func.func @_stage1_kernel(%arg0: i32, %arg1: memref<128x128xf32, #tpu.memory_space<vmem>>, %arg2: memref<1x128xf32, #tpu.memory_space<vmem>>, %arg3: memref<1x128xf32, #tpu.memory_space<vmem>>, %arg4: memref<128x128xbf16, #tpu.memory_space<vmem>>, %arg5: memref<128x128xf32, #tpu.memory_space<vmem>>, %arg6: memref<1x2x128xf32, #tpu.memory_space<vmem>>) attributes {dimension_semantics = [#tpu.dimension_semantics<parallel>], iteration_bounds = array<i64: 4>, scalar_prefetch = 0 : i64, scratch_operands = 0 : i64, tpu.core_type = #tpu.core_type<tc>, window_params = [{transform_indices = @transform_0, window_bounds = array<i64: 128, 128>}, {pipeline_mode = #tpu.pipeline_mode<synchronous>, transform_indices = @transform_1, window_bounds = array<i64: 1, 128>}, {pipeline_mode = #tpu.pipeline_mode<synchronous>, transform_indices = @transform_2, window_bounds = array<i64: 1, 128>}, {pipeline_mode = #tpu.pipeline_mode<synchronous>, transform_indices = @transform_3, window_bounds = array<i64: 128, 128>}, {transform_indices = @transform_4, window_bounds = array<i64: 128, 128>}, {transform_indices = @transform_5, window_bounds = array<i64: 1, 2, 128>}]} {
    %c0 = arith.constant 0 : index
    %c0_0 = arith.constant 0 : index
    %0 = vector.load %arg1[%c0, %c0_0] : memref<128x128xf32, #tpu.memory_space<vmem>>, vector<128x128xf32>
    %c0_1 = arith.constant 0 : index
    %c0_2 = arith.constant 0 : index
    %1 = vector.load %arg2[%c0_1, %c0_2] : memref<1x128xf32, #tpu.memory_space<vmem>>, vector<1x128xf32>
    %2 = vector.broadcast %1 : vector<1x128xf32> to vector<128x128xf32>
    %3 = arith.mulf %0, %2 : vector<128x128xf32>
    %c0_3 = arith.constant 0 : index
    %c0_4 = arith.constant 0 : index
    %4 = vector.load %arg3[%c0_3, %c0_4] : memref<1x128xf32, #tpu.memory_space<vmem>>, vector<1x128xf32>
    %5 = vector.broadcast %4 : vector<1x128xf32> to vector<128x128xf32>
    %6 = arith.addf %3, %5 : vector<128x128xf32>
    %cst = arith.constant 0.000000e+00 : f32
    %7 = vector.broadcast %cst : f32 to vector<128x128xf32>
    %8 = arith.maximumf %6, %7 : vector<128x128xf32>
    %9 = arith.truncf %8 : vector<128x128xf32> to vector<128x128xbf16>
    %c0_5 = arith.constant 0 : index
    %c0_6 = arith.constant 0 : index
    %10 = vector.load %arg4[%c0_5, %c0_6] : memref<128x128xbf16, #tpu.memory_space<vmem>>, vector<128x128xbf16>
    %cst_7 = arith.constant dense<0.000000e+00> : vector<128x128xf32>
    %11 = tpu.matmul %9, %10, %cst_7 {dimension_numbers = #tpu.dot_dimension_numbers<[1], [0], [0], [1], [0, 0, 1, 1], [], []>} : vector<128x128xbf16>, vector<128x128xbf16>, vector<128x128xf32> -> vector<128x128xf32>
    %c0_8 = arith.constant 0 : index
    %c0_9 = arith.constant 0 : index
    %12 = vector.load %arg5[%c0_8, %c0_9] : memref<128x128xf32, #tpu.memory_space<vmem>>, vector<128x128xf32>
    tpu.vector_store %arg5[%c0_8, %c0_9], %11 {strides = array<i32>} : memref<128x128xf32, #tpu.memory_space<vmem>>, vector<128x128xf32>,
    %cst_10 = arith.constant dense<0.000000e+00> : vector<128xf32>
    %13 = vector.multi_reduction <add>, %11, %cst_10 [0] : vector<128x128xf32> to vector<128xf32>
    %14 = vector.shape_cast %13 : vector<128xf32> to vector<1x128xf32>
    %15 = arith.mulf %11, %11 : vector<128x128xf32>
    %cst_11 = arith.constant dense<0.000000e+00> : vector<128xf32>
    %16 = vector.multi_reduction <add>, %15, %cst_11 [0] : vector<128x128xf32> to vector<128xf32>
    %17 = vector.shape_cast %16 : vector<128xf32> to vector<1x128xf32>
    %18 = tpu.concatenate %14, %17 in 0 : vector<1x128xf32>, vector<1x128xf32> -> vector<2x128xf32>
    %c0_12 = arith.constant 0 : index
    %c0_13 = arith.constant 0 : index
    %c0_14 = arith.constant 0 : index
    %19 = vector.load %arg6[%c0_12, %c0_13, %c0_14] : memref<1x2x128xf32, #tpu.memory_space<vmem>>, vector<1x2x128xf32>
    %20 = vector.shape_cast %19 : vector<1x2x128xf32> to vector<2x128xf32>
    %21 = vector.shape_cast %18 : vector<2x128xf32> to vector<1x2x128xf32>
    tpu.vector_store %arg6[%c0_12, %c0_13, %c0_14], %21 {strides = array<i32>} : memref<1x2x128xf32, #tpu.memory_space<vmem>>, vector<1x2x128xf32>,
    return
  }
  func.func @transform_0(%arg0: i32) -> (i32, i32) {
    %c0_i32 = arith.constant 0 : i32
    %c0_i32_0 = arith.constant 0 : i32
    return %arg0, %c0_i32 : i32, i32
  }
  func.func @transform_1(%arg0: i32) -> (i32, i32) {
    %c0_i32 = arith.constant 0 : i32
    %c0_i32_0 = arith.constant 0 : i32
    %c0_i32_1 = arith.constant 0 : i32
    return %c0_i32, %c0_i32_0 : i32, i32
  }
  func.func @transform_2(%arg0: i32) -> (i32, i32) {
    %c0_i32 = arith.constant 0 : i32
    %c0_i32_0 = arith.constant 0 : i32
    %c0_i32_1 = arith.constant 0 : i32
    return %c0_i32, %c0_i32_0 : i32, i32
  }
  func.func @transform_3(%arg0: i32) -> (i32, i32) {
    %c0_i32 = arith.constant 0 : i32
    %c0_i32_0 = arith.constant 0 : i32
    %c0_i32_1 = arith.constant 0 : i32
    return %c0_i32, %c0_i32_0 : i32, i32
  }
  func.func @transform_4(%arg0: i32) -> (i32, i32) {
    %c0_i32 = arith.constant 0 : i32
    %c0_i32_0 = arith.constant 0 : i32
    return %arg0, %c0_i32 : i32, i32
  }
  func.func @transform_5(%arg0: i32) -> (i32, i32, i32) {
    %c0_i32 = arith.constant 0 : i32
    %c0_i32_0 = arith.constant 0 : i32
    %c0_i32_1 = arith.constant 0 : i32
    return %arg0, %c0_i32, %c0_i32_0 : i32, i32, i32
  }
}

module attributes {stable_mosaic.version = 11 : i64} {
  func.func @kernel(%arg0: i32, %arg1: memref<1x8x8x128xf32, #tpu.memory_space<vmem>>, %arg2: memref<1x8x8x128xf32, #tpu.memory_space<vmem>>, %arg3: memref<1x8x8x128xf32, #tpu.memory_space<vmem>>, %arg4: memref<1x8x8x128xf32, #tpu.memory_space<vmem>>, %arg5: memref<1x128xf32, #tpu.memory_space<vmem>>, %arg6: memref<1x128xf32, #tpu.memory_space<vmem>>, %arg7: memref<9x128x128xbf16, #tpu.memory_space<vmem>>, %arg8: memref<1x8x8x128xf32, #tpu.memory_space<vmem>>, %arg9: memref<1x2x128xf32, #tpu.memory_space<vmem>>, %arg10: memref<10x10x128xf32, #tpu.memory_space<vmem>>) attributes {dimension_semantics = [#tpu.dimension_semantics<parallel>], iteration_bounds = array<i64: 2>, scalar_prefetch = 0 : i64, scratch_operands = 1 : i64, tpu.core_type = #tpu.core_type<tc>, window_params = [{transform_indices = @transform_0, window_bounds = array<i64: 1, 8, 8, 128>}, {transform_indices = @transform_1, window_bounds = array<i64: 1, 8, 8, 128>}, {transform_indices = @transform_2, window_bounds = array<i64: 1, 8, 8, 128>}, {transform_indices = @transform_3, window_bounds = array<i64: 1, 8, 8, 128>}, {pipeline_mode = #tpu.pipeline_mode<synchronous>, transform_indices = @transform_4, window_bounds = array<i64: 1, 128>}, {pipeline_mode = #tpu.pipeline_mode<synchronous>, transform_indices = @transform_5, window_bounds = array<i64: 1, 128>}, {pipeline_mode = #tpu.pipeline_mode<synchronous>, transform_indices = @transform_6, window_bounds = array<i64: 9, 128, 128>}, {transform_indices = @transform_7, window_bounds = array<i64: 1, 8, 8, 128>}, {transform_indices = @transform_8, window_bounds = array<i64: 1, 2, 128>}]} {
    %cst = arith.constant 0.000000e+00 : f32
    %0 = vector.broadcast %cst : f32 to vector<64x128xf32>
    %c0 = arith.constant 0 : index
    %c0_0 = arith.constant 0 : index
    %c0_1 = arith.constant 0 : index
    %c0_2 = arith.constant 0 : index
    %1 = vector.load %arg1[%c0, %c0_0, %c0_1, %c0_2] : memref<1x8x8x128xf32, #tpu.memory_space<vmem>>, vector<1x8x8x128xf32>
    %2 = vector.shape_cast %1 : vector<1x8x8x128xf32> to vector<8x8x128xf32>
    %c0_3 = arith.constant 0 : index
    %c0_4 = arith.constant 0 : index
    %3 = vector.load %arg5[%c0_3, %c0_4] : memref<1x128xf32, #tpu.memory_space<vmem>>, vector<1x128xf32>
    %4 = vector.shape_cast %3 : vector<1x128xf32> to vector<1x1x128xf32>
    %5 = vector.broadcast %4 : vector<1x1x128xf32> to vector<8x8x128xf32>
    %6 = arith.mulf %2, %5 : vector<8x8x128xf32>
    %c0_5 = arith.constant 0 : index
    %c0_6 = arith.constant 0 : index
    %7 = vector.load %arg6[%c0_5, %c0_6] : memref<1x128xf32, #tpu.memory_space<vmem>>, vector<1x128xf32>
    %8 = vector.shape_cast %7 : vector<1x128xf32> to vector<1x1x128xf32>
    %9 = vector.broadcast %8 : vector<1x1x128xf32> to vector<8x8x128xf32>
    %10 = arith.addf %6, %9 : vector<8x8x128xf32>
    %cst_7 = arith.constant 0.000000e+00 : f32
    %11 = vector.broadcast %cst_7 : f32 to vector<8x8x128xf32>
    %12 = arith.maximumf %10, %11 : vector<8x8x128xf32>
    %cst_8 = arith.constant 0.000000e+00 : f32
    %13 = vector.broadcast %cst_8 : f32 to vector<10x10x128xf32>
    %c0_9 = arith.constant 0 : index
    %c0_10 = arith.constant 0 : index
    %c0_11 = arith.constant 0 : index
    %14 = vector.load %arg10[%c0_9, %c0_10, %c0_11] : memref<10x10x128xf32, #tpu.memory_space<vmem>>, vector<10x10x128xf32>
    tpu.vector_store %arg10[%c0_9, %c0_10, %c0_11], %13 {strides = array<i32>} : memref<10x10x128xf32, #tpu.memory_space<vmem>>, vector<10x10x128xf32>,
    %c1 = arith.constant 1 : index
    %c1_12 = arith.constant 1 : index
    %c0_13 = arith.constant 0 : index
    %15 = vector.load %arg10[%c1, %c1_12, %c0_13] : memref<10x10x128xf32, #tpu.memory_space<vmem>>, vector<8x8x128xf32>
    tpu.vector_store %arg10[%c1, %c1_12, %c0_13], %12 {strides = array<i32>} : memref<10x10x128xf32, #tpu.memory_space<vmem>>, vector<8x8x128xf32>,
    %c1_14 = arith.constant 1 : index
    %c1_15 = arith.constant 1 : index
    %c0_16 = arith.constant 0 : index
    %16 = vector.load %arg10[%c1_14, %c1_15, %c0_16] : memref<10x10x128xf32, #tpu.memory_space<vmem>>, vector<8x8x128xf32>
    %17 = vector.shape_cast %16 : vector<8x8x128xf32> to vector<64x128xf32>
    %18 = arith.truncf %17 : vector<64x128xf32> to vector<64x128xbf16>
    %c4 = arith.constant 4 : index
    %c0_17 = arith.constant 0 : index
    %c0_18 = arith.constant 0 : index
    %19 = vector.load %arg7[%c4, %c0_17, %c0_18] : memref<9x128x128xbf16, #tpu.memory_space<vmem>>, vector<1x128x128xbf16>
    %20 = vector.shape_cast %19 : vector<1x128x128xbf16> to vector<128x128xbf16>
    %cst_19 = arith.constant dense<0.000000e+00> : vector<64x128xf32>
    %21 = tpu.matmul %18, %20, %cst_19 {dimension_numbers = #tpu.dot_dimension_numbers<[1], [0], [0], [1], [0, 0, 1, 1], [], []>} : vector<64x128xbf16>, vector<128x128xbf16>, vector<64x128xf32> -> vector<64x128xf32>
    %22 = arith.addf %0, %21 : vector<64x128xf32>
    %c0_20 = arith.constant 0 : index
    %c0_21 = arith.constant 0 : index
    %c0_22 = arith.constant 0 : index
    %c0_23 = arith.constant 0 : index
    %23 = vector.load %arg2[%c0_20, %c0_21, %c0_22, %c0_23] : memref<1x8x8x128xf32, #tpu.memory_space<vmem>>, vector<1x8x8x128xf32>
    %24 = vector.shape_cast %23 : vector<1x8x8x128xf32> to vector<8x8x128xf32>
    %c0_24 = arith.constant 0 : index
    %c0_25 = arith.constant 0 : index
    %25 = vector.load %arg5[%c0_24, %c0_25] : memref<1x128xf32, #tpu.memory_space<vmem>>, vector<1x128xf32>
    %26 = vector.shape_cast %25 : vector<1x128xf32> to vector<1x1x128xf32>
    %27 = vector.broadcast %26 : vector<1x1x128xf32> to vector<8x8x128xf32>
    %28 = arith.mulf %24, %27 : vector<8x8x128xf32>
    %c0_26 = arith.constant 0 : index
    %c0_27 = arith.constant 0 : index
    %29 = vector.load %arg6[%c0_26, %c0_27] : memref<1x128xf32, #tpu.memory_space<vmem>>, vector<1x128xf32>
    %30 = vector.shape_cast %29 : vector<1x128xf32> to vector<1x1x128xf32>
    %31 = vector.broadcast %30 : vector<1x1x128xf32> to vector<8x8x128xf32>
    %32 = arith.addf %28, %31 : vector<8x8x128xf32>
    %cst_28 = arith.constant 0.000000e+00 : f32
    %33 = vector.broadcast %cst_28 : f32 to vector<8x8x128xf32>
    %34 = arith.maximumf %32, %33 : vector<8x8x128xf32>
    %cst_29 = arith.constant 0.000000e+00 : f32
    %35 = vector.broadcast %cst_29 : f32 to vector<10x10x128xf32>
    %c0_30 = arith.constant 0 : index
    %c0_31 = arith.constant 0 : index
    %c0_32 = arith.constant 0 : index
    %36 = vector.load %arg10[%c0_30, %c0_31, %c0_32] : memref<10x10x128xf32, #tpu.memory_space<vmem>>, vector<10x10x128xf32>
    tpu.vector_store %arg10[%c0_30, %c0_31, %c0_32], %35 {strides = array<i32>} : memref<10x10x128xf32, #tpu.memory_space<vmem>>, vector<10x10x128xf32>,
    %c1_33 = arith.constant 1 : index
    %c1_34 = arith.constant 1 : index
    %c0_35 = arith.constant 0 : index
    %37 = vector.load %arg10[%c1_33, %c1_34, %c0_35] : memref<10x10x128xf32, #tpu.memory_space<vmem>>, vector<8x8x128xf32>
    tpu.vector_store %arg10[%c1_33, %c1_34, %c0_35], %34 {strides = array<i32>} : memref<10x10x128xf32, #tpu.memory_space<vmem>>, vector<8x8x128xf32>,
    %c1_36 = arith.constant 1 : index
    %c0_37 = arith.constant 0 : index
    %c0_38 = arith.constant 0 : index
    %38 = vector.load %arg10[%c1_36, %c0_37, %c0_38] : memref<10x10x128xf32, #tpu.memory_space<vmem>>, vector<8x8x128xf32>
    %39 = vector.shape_cast %38 : vector<8x8x128xf32> to vector<64x128xf32>
    %40 = arith.truncf %39 : vector<64x128xf32> to vector<64x128xbf16>
    %c3 = arith.constant 3 : index
    %c0_39 = arith.constant 0 : index
    %c0_40 = arith.constant 0 : index
    %41 = vector.load %arg7[%c3, %c0_39, %c0_40] : memref<9x128x128xbf16, #tpu.memory_space<vmem>>, vector<1x128x128xbf16>
    %42 = vector.shape_cast %41 : vector<1x128x128xbf16> to vector<128x128xbf16>
    %cst_41 = arith.constant dense<0.000000e+00> : vector<64x128xf32>
    %43 = tpu.matmul %40, %42, %cst_41 {dimension_numbers = #tpu.dot_dimension_numbers<[1], [0], [0], [1], [0, 0, 1, 1], [], []>} : vector<64x128xbf16>, vector<128x128xbf16>, vector<64x128xf32> -> vector<64x128xf32>
    %44 = arith.addf %22, %43 : vector<64x128xf32>
    %c1_42 = arith.constant 1 : index
    %c1_43 = arith.constant 1 : index
    %c0_44 = arith.constant 0 : index
    %45 = vector.load %arg10[%c1_42, %c1_43, %c0_44] : memref<10x10x128xf32, #tpu.memory_space<vmem>>, vector<8x8x128xf32>
    %46 = vector.shape_cast %45 : vector<8x8x128xf32> to vector<64x128xf32>
    %47 = arith.truncf %46 : vector<64x128xf32> to vector<64x128xbf16>
    %c5 = arith.constant 5 : index
    %c0_45 = arith.constant 0 : index
    %c0_46 = arith.constant 0 : index
    %48 = vector.load %arg7[%c5, %c0_45, %c0_46] : memref<9x128x128xbf16, #tpu.memory_space<vmem>>, vector<1x128x128xbf16>
    %49 = vector.shape_cast %48 : vector<1x128x128xbf16> to vector<128x128xbf16>
    %cst_47 = arith.constant dense<0.000000e+00> : vector<64x128xf32>
    %50 = tpu.matmul %47, %49, %cst_47 {dimension_numbers = #tpu.dot_dimension_numbers<[1], [0], [0], [1], [0, 0, 1, 1], [], []>} : vector<64x128xbf16>, vector<128x128xbf16>, vector<64x128xf32> -> vector<64x128xf32>
    %51 = arith.addf %44, %50 : vector<64x128xf32>
    %c0_48 = arith.constant 0 : index
    %c0_49 = arith.constant 0 : index
    %c0_50 = arith.constant 0 : index
    %c0_51 = arith.constant 0 : index
    %52 = vector.load %arg3[%c0_48, %c0_49, %c0_50, %c0_51] : memref<1x8x8x128xf32, #tpu.memory_space<vmem>>, vector<1x8x8x128xf32>
    %53 = vector.shape_cast %52 : vector<1x8x8x128xf32> to vector<8x8x128xf32>
    %c0_52 = arith.constant 0 : index
    %c0_53 = arith.constant 0 : index
    %54 = vector.load %arg5[%c0_52, %c0_53] : memref<1x128xf32, #tpu.memory_space<vmem>>, vector<1x128xf32>
    %55 = vector.shape_cast %54 : vector<1x128xf32> to vector<1x1x128xf32>
    %56 = vector.broadcast %55 : vector<1x1x128xf32> to vector<8x8x128xf32>
    %57 = arith.mulf %53, %56 : vector<8x8x128xf32>
    %c0_54 = arith.constant 0 : index
    %c0_55 = arith.constant 0 : index
    %58 = vector.load %arg6[%c0_54, %c0_55] : memref<1x128xf32, #tpu.memory_space<vmem>>, vector<1x128xf32>
    %59 = vector.shape_cast %58 : vector<1x128xf32> to vector<1x1x128xf32>
    %60 = vector.broadcast %59 : vector<1x1x128xf32> to vector<8x8x128xf32>
    %61 = arith.addf %57, %60 : vector<8x8x128xf32>
    %cst_56 = arith.constant 0.000000e+00 : f32
    %62 = vector.broadcast %cst_56 : f32 to vector<8x8x128xf32>
    %63 = arith.maximumf %61, %62 : vector<8x8x128xf32>
    %cst_57 = arith.constant 0.000000e+00 : f32
    %64 = vector.broadcast %cst_57 : f32 to vector<10x10x128xf32>
    %c0_58 = arith.constant 0 : index
    %c0_59 = arith.constant 0 : index
    %c0_60 = arith.constant 0 : index
    %65 = vector.load %arg10[%c0_58, %c0_59, %c0_60] : memref<10x10x128xf32, #tpu.memory_space<vmem>>, vector<10x10x128xf32>
    tpu.vector_store %arg10[%c0_58, %c0_59, %c0_60], %64 {strides = array<i32>} : memref<10x10x128xf32, #tpu.memory_space<vmem>>, vector<10x10x128xf32>,
    %c1_61 = arith.constant 1 : index
    %c1_62 = arith.constant 1 : index
    %c0_63 = arith.constant 0 : index
    %66 = vector.load %arg10[%c1_61, %c1_62, %c0_63] : memref<10x10x128xf32, #tpu.memory_space<vmem>>, vector<8x8x128xf32>
    tpu.vector_store %arg10[%c1_61, %c1_62, %c0_63], %63 {strides = array<i32>} : memref<10x10x128xf32, #tpu.memory_space<vmem>>, vector<8x8x128xf32>,
    %c0_64 = arith.constant 0 : index
    %c1_65 = arith.constant 1 : index
    %c0_66 = arith.constant 0 : index
    %67 = vector.load %arg10[%c0_64, %c1_65, %c0_66] : memref<10x10x128xf32, #tpu.memory_space<vmem>>, vector<8x8x128xf32>
    %68 = vector.shape_cast %67 : vector<8x8x128xf32> to vector<64x128xf32>
    %69 = arith.truncf %68 : vector<64x128xf32> to vector<64x128xbf16>
    %c1_67 = arith.constant 1 : index
    %c0_68 = arith.constant 0 : index
    %c0_69 = arith.constant 0 : index
    %70 = vector.load %arg7[%c1_67, %c0_68, %c0_69] : memref<9x128x128xbf16, #tpu.memory_space<vmem>>, vector<1x128x128xbf16>
    %71 = vector.shape_cast %70 : vector<1x128x128xbf16> to vector<128x128xbf16>
    %cst_70 = arith.constant dense<0.000000e+00> : vector<64x128xf32>
    %72 = tpu.matmul %69, %71, %cst_70 {dimension_numbers = #tpu.dot_dimension_numbers<[1], [0], [0], [1], [0, 0, 1, 1], [], []>} : vector<64x128xbf16>, vector<128x128xbf16>, vector<64x128xf32> -> vector<64x128xf32>
    %73 = arith.addf %51, %72 : vector<64x128xf32>
    %c1_71 = arith.constant 1 : index
    %c1_72 = arith.constant 1 : index
    %c0_73 = arith.constant 0 : index
    %74 = vector.load %arg10[%c1_71, %c1_72, %c0_73] : memref<10x10x128xf32, #tpu.memory_space<vmem>>, vector<8x8x128xf32>
    %75 = vector.shape_cast %74 : vector<8x8x128xf32> to vector<64x128xf32>
    %76 = arith.truncf %75 : vector<64x128xf32> to vector<64x128xbf16>
    %c7 = arith.constant 7 : index
    %c0_74 = arith.constant 0 : index
    %c0_75 = arith.constant 0 : index
    %77 = vector.load %arg7[%c7, %c0_74, %c0_75] : memref<9x128x128xbf16, #tpu.memory_space<vmem>>, vector<1x128x128xbf16>
    %78 = vector.shape_cast %77 : vector<1x128x128xbf16> to vector<128x128xbf16>
    %cst_76 = arith.constant dense<0.000000e+00> : vector<64x128xf32>
    %79 = tpu.matmul %76, %78, %cst_76 {dimension_numbers = #tpu.dot_dimension_numbers<[1], [0], [0], [1], [0, 0, 1, 1], [], []>} : vector<64x128xbf16>, vector<128x128xbf16>, vector<64x128xf32> -> vector<64x128xf32>
    %80 = arith.addf %73, %79 : vector<64x128xf32>
    %c0_77 = arith.constant 0 : index
    %c0_78 = arith.constant 0 : index
    %c0_79 = arith.constant 0 : index
    %c0_80 = arith.constant 0 : index
    %81 = vector.load %arg4[%c0_77, %c0_78, %c0_79, %c0_80] : memref<1x8x8x128xf32, #tpu.memory_space<vmem>>, vector<1x8x8x128xf32>
    %82 = vector.shape_cast %81 : vector<1x8x8x128xf32> to vector<8x8x128xf32>
    %c0_81 = arith.constant 0 : index
    %c0_82 = arith.constant 0 : index
    %83 = vector.load %arg5[%c0_81, %c0_82] : memref<1x128xf32, #tpu.memory_space<vmem>>, vector<1x128xf32>
    %84 = vector.shape_cast %83 : vector<1x128xf32> to vector<1x1x128xf32>
    %85 = vector.broadcast %84 : vector<1x1x128xf32> to vector<8x8x128xf32>
    %86 = arith.mulf %82, %85 : vector<8x8x128xf32>
    %c0_83 = arith.constant 0 : index
    %c0_84 = arith.constant 0 : index
    %87 = vector.load %arg6[%c0_83, %c0_84] : memref<1x128xf32, #tpu.memory_space<vmem>>, vector<1x128xf32>
    %88 = vector.shape_cast %87 : vector<1x128xf32> to vector<1x1x128xf32>
    %89 = vector.broadcast %88 : vector<1x1x128xf32> to vector<8x8x128xf32>
    %90 = arith.addf %86, %89 : vector<8x8x128xf32>
    %cst_85 = arith.constant 0.000000e+00 : f32
    %91 = vector.broadcast %cst_85 : f32 to vector<8x8x128xf32>
    %92 = arith.maximumf %90, %91 : vector<8x8x128xf32>
    %cst_86 = arith.constant 0.000000e+00 : f32
    %93 = vector.broadcast %cst_86 : f32 to vector<10x10x128xf32>
    %c0_87 = arith.constant 0 : index
    %c0_88 = arith.constant 0 : index
    %c0_89 = arith.constant 0 : index
    %94 = vector.load %arg10[%c0_87, %c0_88, %c0_89] : memref<10x10x128xf32, #tpu.memory_space<vmem>>, vector<10x10x128xf32>
    tpu.vector_store %arg10[%c0_87, %c0_88, %c0_89], %93 {strides = array<i32>} : memref<10x10x128xf32, #tpu.memory_space<vmem>>, vector<10x10x128xf32>,
    %c1_90 = arith.constant 1 : index
    %c1_91 = arith.constant 1 : index
    %c0_92 = arith.constant 0 : index
    %95 = vector.load %arg10[%c1_90, %c1_91, %c0_92] : memref<10x10x128xf32, #tpu.memory_space<vmem>>, vector<8x8x128xf32>
    tpu.vector_store %arg10[%c1_90, %c1_91, %c0_92], %92 {strides = array<i32>} : memref<10x10x128xf32, #tpu.memory_space<vmem>>, vector<8x8x128xf32>,
    %c0_93 = arith.constant 0 : index
    %c0_94 = arith.constant 0 : index
    %c0_95 = arith.constant 0 : index
    %96 = vector.load %arg10[%c0_93, %c0_94, %c0_95] : memref<10x10x128xf32, #tpu.memory_space<vmem>>, vector<8x8x128xf32>
    %97 = vector.shape_cast %96 : vector<8x8x128xf32> to vector<64x128xf32>
    %98 = arith.truncf %97 : vector<64x128xf32> to vector<64x128xbf16>
    %c0_96 = arith.constant 0 : index
    %c0_97 = arith.constant 0 : index
    %c0_98 = arith.constant 0 : index
    %99 = vector.load %arg7[%c0_96, %c0_97, %c0_98] : memref<9x128x128xbf16, #tpu.memory_space<vmem>>, vector<1x128x128xbf16>
    %100 = vector.shape_cast %99 : vector<1x128x128xbf16> to vector<128x128xbf16>
    %cst_99 = arith.constant dense<0.000000e+00> : vector<64x128xf32>
    %101 = tpu.matmul %98, %100, %cst_99 {dimension_numbers = #tpu.dot_dimension_numbers<[1], [0], [0], [1], [0, 0, 1, 1], [], []>} : vector<64x128xbf16>, vector<128x128xbf16>, vector<64x128xf32> -> vector<64x128xf32>
    %102 = arith.addf %80, %101 : vector<64x128xf32>
    %c0_100 = arith.constant 0 : index
    %c1_101 = arith.constant 1 : index
    %c0_102 = arith.constant 0 : index
    %103 = vector.load %arg10[%c0_100, %c1_101, %c0_102] : memref<10x10x128xf32, #tpu.memory_space<vmem>>, vector<8x8x128xf32>
    %104 = vector.shape_cast %103 : vector<8x8x128xf32> to vector<64x128xf32>
    %105 = arith.truncf %104 : vector<64x128xf32> to vector<64x128xbf16>
    %c2 = arith.constant 2 : index
    %c0_103 = arith.constant 0 : index
    %c0_104 = arith.constant 0 : index
    %106 = vector.load %arg7[%c2, %c0_103, %c0_104] : memref<9x128x128xbf16, #tpu.memory_space<vmem>>, vector<1x128x128xbf16>
    %107 = vector.shape_cast %106 : vector<1x128x128xbf16> to vector<128x128xbf16>
    %cst_105 = arith.constant dense<0.000000e+00> : vector<64x128xf32>
    %108 = tpu.matmul %105, %107, %cst_105 {dimension_numbers = #tpu.dot_dimension_numbers<[1], [0], [0], [1], [0, 0, 1, 1], [], []>} : vector<64x128xbf16>, vector<128x128xbf16>, vector<64x128xf32> -> vector<64x128xf32>
    %109 = arith.addf %102, %108 : vector<64x128xf32>
    %c1_106 = arith.constant 1 : index
    %c0_107 = arith.constant 0 : index
    %c0_108 = arith.constant 0 : index
    %110 = vector.load %arg10[%c1_106, %c0_107, %c0_108] : memref<10x10x128xf32, #tpu.memory_space<vmem>>, vector<8x8x128xf32>
    %111 = vector.shape_cast %110 : vector<8x8x128xf32> to vector<64x128xf32>
    %112 = arith.truncf %111 : vector<64x128xf32> to vector<64x128xbf16>
    %c6 = arith.constant 6 : index
    %c0_109 = arith.constant 0 : index
    %c0_110 = arith.constant 0 : index
    %113 = vector.load %arg7[%c6, %c0_109, %c0_110] : memref<9x128x128xbf16, #tpu.memory_space<vmem>>, vector<1x128x128xbf16>
    %114 = vector.shape_cast %113 : vector<1x128x128xbf16> to vector<128x128xbf16>
    %cst_111 = arith.constant dense<0.000000e+00> : vector<64x128xf32>
    %115 = tpu.matmul %112, %114, %cst_111 {dimension_numbers = #tpu.dot_dimension_numbers<[1], [0], [0], [1], [0, 0, 1, 1], [], []>} : vector<64x128xbf16>, vector<128x128xbf16>, vector<64x128xf32> -> vector<64x128xf32>
    %116 = arith.addf %109, %115 : vector<64x128xf32>
    %c1_112 = arith.constant 1 : index
    %c1_113 = arith.constant 1 : index
    %c0_114 = arith.constant 0 : index
    %117 = vector.load %arg10[%c1_112, %c1_113, %c0_114] : memref<10x10x128xf32, #tpu.memory_space<vmem>>, vector<8x8x128xf32>
    %118 = vector.shape_cast %117 : vector<8x8x128xf32> to vector<64x128xf32>
    %119 = arith.truncf %118 : vector<64x128xf32> to vector<64x128xbf16>
    %c8 = arith.constant 8 : index
    %c0_115 = arith.constant 0 : index
    %c0_116 = arith.constant 0 : index
    %120 = vector.load %arg7[%c8, %c0_115, %c0_116] : memref<9x128x128xbf16, #tpu.memory_space<vmem>>, vector<1x128x128xbf16>
    %121 = vector.shape_cast %120 : vector<1x128x128xbf16> to vector<128x128xbf16>
    %cst_117 = arith.constant dense<0.000000e+00> : vector<64x128xf32>
    %122 = tpu.matmul %119, %121, %cst_117 {dimension_numbers = #tpu.dot_dimension_numbers<[1], [0], [0], [1], [0, 0, 1, 1], [], []>} : vector<64x128xbf16>, vector<128x128xbf16>, vector<64x128xf32> -> vector<64x128xf32>
    %123 = arith.addf %116, %122 : vector<64x128xf32>
    %124 = vector.shape_cast %123 : vector<64x128xf32> to vector<8x8x128xf32>
    %c0_118 = arith.constant 0 : index
    %c0_119 = arith.constant 0 : index
    %c0_120 = arith.constant 0 : index
    %c0_121 = arith.constant 0 : index
    %125 = vector.load %arg8[%c0_118, %c0_119, %c0_120, %c0_121] : memref<1x8x8x128xf32, #tpu.memory_space<vmem>>, vector<1x8x8x128xf32>
    %126 = vector.shape_cast %125 : vector<1x8x8x128xf32> to vector<8x8x128xf32>
    %127 = vector.shape_cast %124 : vector<8x8x128xf32> to vector<1x8x8x128xf32>
    tpu.vector_store %arg8[%c0_118, %c0_119, %c0_120, %c0_121], %127 {strides = array<i32>} : memref<1x8x8x128xf32, #tpu.memory_space<vmem>>, vector<1x8x8x128xf32>,
    %cst_122 = arith.constant dense<0.000000e+00> : vector<128xf32>
    %128 = vector.multi_reduction <add>, %123, %cst_122 [0] : vector<64x128xf32> to vector<128xf32>
    %129 = vector.shape_cast %128 : vector<128xf32> to vector<1x128xf32>
    %130 = arith.mulf %123, %123 : vector<64x128xf32>
    %cst_123 = arith.constant dense<0.000000e+00> : vector<128xf32>
    %131 = vector.multi_reduction <add>, %130, %cst_123 [0] : vector<64x128xf32> to vector<128xf32>
    %132 = vector.shape_cast %131 : vector<128xf32> to vector<1x128xf32>
    %133 = tpu.concatenate %129, %132 in 0 : vector<1x128xf32>, vector<1x128xf32> -> vector<2x128xf32>
    %c0_124 = arith.constant 0 : index
    %c0_125 = arith.constant 0 : index
    %c0_126 = arith.constant 0 : index
    %134 = vector.load %arg9[%c0_124, %c0_125, %c0_126] : memref<1x2x128xf32, #tpu.memory_space<vmem>>, vector<1x2x128xf32>
    %135 = vector.shape_cast %134 : vector<1x2x128xf32> to vector<2x128xf32>
    %136 = vector.shape_cast %133 : vector<2x128xf32> to vector<1x2x128xf32>
    tpu.vector_store %arg9[%c0_124, %c0_125, %c0_126], %136 {strides = array<i32>} : memref<1x2x128xf32, #tpu.memory_space<vmem>>, vector<1x2x128xf32>,
    return
  }
  func.func @transform_0(%arg0: i32) -> (i32, i32, i32, i32) {
    %c0_i32 = arith.constant 0 : i32
    %c0_i32_0 = arith.constant 0 : i32
    %c0_i32_1 = arith.constant 0 : i32
    %c0_i32_2 = arith.constant 0 : i32
    return %arg0, %c0_i32, %c0_i32_0, %c0_i32_1 : i32, i32, i32, i32
  }
  func.func @transform_1(%arg0: i32) -> (i32, i32, i32, i32) {
    %c0_i32 = arith.constant 0 : i32
    %c0_i32_0 = arith.constant 0 : i32
    %c0_i32_1 = arith.constant 0 : i32
    %c0_i32_2 = arith.constant 0 : i32
    return %arg0, %c0_i32, %c0_i32_0, %c0_i32_1 : i32, i32, i32, i32
  }
  func.func @transform_2(%arg0: i32) -> (i32, i32, i32, i32) {
    %c0_i32 = arith.constant 0 : i32
    %c0_i32_0 = arith.constant 0 : i32
    %c0_i32_1 = arith.constant 0 : i32
    %c0_i32_2 = arith.constant 0 : i32
    return %arg0, %c0_i32, %c0_i32_0, %c0_i32_1 : i32, i32, i32, i32
  }
  func.func @transform_3(%arg0: i32) -> (i32, i32, i32, i32) {
    %c0_i32 = arith.constant 0 : i32
    %c0_i32_0 = arith.constant 0 : i32
    %c0_i32_1 = arith.constant 0 : i32
    %c0_i32_2 = arith.constant 0 : i32
    return %arg0, %c0_i32, %c0_i32_0, %c0_i32_1 : i32, i32, i32, i32
  }
  func.func @transform_4(%arg0: i32) -> (i32, i32) {
    %c0_i32 = arith.constant 0 : i32
    %c0_i32_0 = arith.constant 0 : i32
    %c0_i32_1 = arith.constant 0 : i32
    return %c0_i32, %c0_i32_0 : i32, i32
  }
  func.func @transform_5(%arg0: i32) -> (i32, i32) {
    %c0_i32 = arith.constant 0 : i32
    %c0_i32_0 = arith.constant 0 : i32
    %c0_i32_1 = arith.constant 0 : i32
    return %c0_i32, %c0_i32_0 : i32, i32
  }
  func.func @transform_6(%arg0: i32) -> (i32, i32, i32) {
    %c0_i32 = arith.constant 0 : i32
    %c0_i32_0 = arith.constant 0 : i32
    %c0_i32_1 = arith.constant 0 : i32
    %c0_i32_2 = arith.constant 0 : i32
    return %c0_i32, %c0_i32_0, %c0_i32_1 : i32, i32, i32
  }
  func.func @transform_7(%arg0: i32) -> (i32, i32, i32, i32) {
    %c0_i32 = arith.constant 0 : i32
    %c0_i32_0 = arith.constant 0 : i32
    %c0_i32_1 = arith.constant 0 : i32
    %c0_i32_2 = arith.constant 0 : i32
    return %arg0, %c0_i32, %c0_i32_0, %c0_i32_1 : i32, i32, i32, i32
  }
  func.func @transform_8(%arg0: i32) -> (i32, i32, i32) {
    %c0_i32 = arith.constant 0 : i32
    %c0_i32_0 = arith.constant 0 : i32
    %c0_i32_1 = arith.constant 0 : i32
    return %arg0, %c0_i32, %c0_i32_0 : i32, i32, i32
  }
}

module attributes {stable_mosaic.version = 11 : i64} {
  func.func @_stage3_kernel(%arg0: i32, %arg1: memref<128x128xf32, #tpu.memory_space<vmem>>, %arg2: memref<128x128xf32, #tpu.memory_space<vmem>>, %arg3: memref<1x128xf32, #tpu.memory_space<vmem>>, %arg4: memref<1x128xf32, #tpu.memory_space<vmem>>, %arg5: memref<256x128xbf16, #tpu.memory_space<vmem>>, %arg6: memref<128x128xf32, #tpu.memory_space<vmem>>) attributes {dimension_semantics = [#tpu.dimension_semantics<parallel>], iteration_bounds = array<i64: 1>, scalar_prefetch = 0 : i64, scratch_operands = 0 : i64, tpu.core_type = #tpu.core_type<tc>, window_params = [{transform_indices = @transform_0, window_bounds = array<i64: 128, 128>}, {transform_indices = @transform_1, window_bounds = array<i64: 128, 128>}, {pipeline_mode = #tpu.pipeline_mode<synchronous>, transform_indices = @transform_2, window_bounds = array<i64: 1, 128>}, {pipeline_mode = #tpu.pipeline_mode<synchronous>, transform_indices = @transform_3, window_bounds = array<i64: 1, 128>}, {pipeline_mode = #tpu.pipeline_mode<synchronous>, transform_indices = @transform_4, window_bounds = array<i64: 256, 128>}, {transform_indices = @transform_5, window_bounds = array<i64: 128, 128>}]} {
    %c0 = arith.constant 0 : index
    %c0_0 = arith.constant 0 : index
    %0 = vector.load %arg1[%c0, %c0_0] : memref<128x128xf32, #tpu.memory_space<vmem>>, vector<128x128xf32>
    %c0_1 = arith.constant 0 : index
    %c0_2 = arith.constant 0 : index
    %1 = vector.load %arg3[%c0_1, %c0_2] : memref<1x128xf32, #tpu.memory_space<vmem>>, vector<1x128xf32>
    %2 = vector.broadcast %1 : vector<1x128xf32> to vector<128x128xf32>
    %3 = arith.mulf %0, %2 : vector<128x128xf32>
    %c0_3 = arith.constant 0 : index
    %c0_4 = arith.constant 0 : index
    %4 = vector.load %arg4[%c0_3, %c0_4] : memref<1x128xf32, #tpu.memory_space<vmem>>, vector<1x128xf32>
    %5 = vector.broadcast %4 : vector<1x128xf32> to vector<128x128xf32>
    %6 = arith.addf %3, %5 : vector<128x128xf32>
    %cst = arith.constant 0.000000e+00 : f32
    %7 = vector.broadcast %cst : f32 to vector<128x128xf32>
    %8 = arith.maximumf %6, %7 : vector<128x128xf32>
    %9 = arith.truncf %8 : vector<128x128xf32> to vector<128x128xbf16>
    %c0_5 = arith.constant 0 : index
    %c0_6 = arith.constant 0 : index
    %10 = vector.load %arg2[%c0_5, %c0_6] : memref<128x128xf32, #tpu.memory_space<vmem>>, vector<128x128xf32>
    %11 = arith.truncf %10 : vector<128x128xf32> to vector<128x128xbf16>
    %12 = tpu.concatenate %9, %11 in 1 : vector<128x128xbf16>, vector<128x128xbf16> -> vector<128x256xbf16>
    %c0_7 = arith.constant 0 : index
    %c0_8 = arith.constant 0 : index
    %13 = vector.load %arg5[%c0_7, %c0_8] : memref<256x128xbf16, #tpu.memory_space<vmem>>, vector<256x128xbf16>
    %cst_9 = arith.constant dense<0.000000e+00> : vector<128x128xf32>
    %14 = tpu.matmul %12, %13, %cst_9 {dimension_numbers = #tpu.dot_dimension_numbers<[1], [0], [0], [1], [0, 0, 1, 1], [], []>} : vector<128x256xbf16>, vector<256x128xbf16>, vector<128x128xf32> -> vector<128x128xf32>
    %c0_10 = arith.constant 0 : index
    %c0_11 = arith.constant 0 : index
    %15 = vector.load %arg6[%c0_10, %c0_11] : memref<128x128xf32, #tpu.memory_space<vmem>>, vector<128x128xf32>
    tpu.vector_store %arg6[%c0_10, %c0_11], %14 {strides = array<i32>} : memref<128x128xf32, #tpu.memory_space<vmem>>, vector<128x128xf32>,
    return
  }
  func.func @transform_0(%arg0: i32) -> (i32, i32) {
    %c0_i32 = arith.constant 0 : i32
    %c0_i32_0 = arith.constant 0 : i32
    return %arg0, %c0_i32 : i32, i32
  }
  func.func @transform_1(%arg0: i32) -> (i32, i32) {
    %c0_i32 = arith.constant 0 : i32
    %c0_i32_0 = arith.constant 0 : i32
    return %arg0, %c0_i32 : i32, i32
  }
  func.func @transform_2(%arg0: i32) -> (i32, i32) {
    %c0_i32 = arith.constant 0 : i32
    %c0_i32_0 = arith.constant 0 : i32
    %c0_i32_1 = arith.constant 0 : i32
    return %c0_i32, %c0_i32_0 : i32, i32
  }
  func.func @transform_3(%arg0: i32) -> (i32, i32) {
    %c0_i32 = arith.constant 0 : i32
    %c0_i32_0 = arith.constant 0 : i32
    %c0_i32_1 = arith.constant 0 : i32
    return %c0_i32, %c0_i32_0 : i32, i32
  }
  func.func @transform_4(%arg0: i32) -> (i32, i32) {
    %c0_i32 = arith.constant 0 : i32
    %c0_i32_0 = arith.constant 0 : i32
    %c0_i32_1 = arith.constant 0 : i32
    return %c0_i32, %c0_i32_0 : i32, i32
  }
  func.func @transform_5(%arg0: i32) -> (i32, i32) {
    %c0_i32 = arith.constant 0 : i32
    %c0_i32_0 = arith.constant 0 : i32
    return %arg0, %c0_i32 : i32, i32
  }
}

</mosaic_0001>

<bundles_post_ra>
// kernel: bottleneck_forward.3
= control target key start
LH: loop header
LB: loop body
LE: loop exit
PB: predicated region body
PF: predicated region fallthrough
CT: control target
= control target key end

     0   :  { %s720_s18 = smov 0   ;;  %s854_s0 = inlined_call_operand.vmem [shape: f32[512,128], index: 0, kind: input, shape index: {}]   ;;  %s855_s1 = inlined_call_operand.vmem [shape: f32[1,128], index: 1, kind: input, shape index: {}]   ;;  %s856_s2 = inlined_call_operand.vmem [shape: f32[1,128], index: 2, kind: input, shape index: {}]   ;;  %s857_s3 = inlined_call_operand.vmem [shape: bf16[128,128], index: 3, kind: input, shape index: {}]   ;;  %s858_s4 = inlined_call_operand.vmem [shape: f32[512,128], index: 4, kind: output, shape index: {0}]   ;;  %s859_s5 = inlined_call_operand.vmem [shape: f32[4,2,128], index: 5, kind: output, shape index: {1}]  }
   0x1 LB: > { %s726_s19 = sadd.s32 4294967295, %s688_s18   ;;  %p600_p0 = scmp.ge.s32.totalorder %s688_s18, 1  ;;  %s688_s18 = sphi %s720_s18, %s16_s18  }
   0x2   : > { %p191_p1 = scmp.lt.s32.totalorder %s688_s18, 5 }
   0x4   : > { %p192_p2 = pnand %p600_p0, %p191_p1 }
   0x5   : > { %s601_s22 = sshll.u32 (!%p192_p2), %s726_s19, 4  ;;  %p235_p4 = scmp.lt.s32.totalorder (!%p192_p2), %s726_s19, 3 }
   0x6   : > { %195 = sbr.rel (%p192_p2) target bundleno = 235 (0xeb), region = 36  ;;  %p224_p3 = scmp.lt.s32.totalorder (!%p192_p2), %s601_s22, 63 }
   0xb   : > { %v647_v0 = vld [vmem:[%s857_s3 + $0x38] sm:$0xff]  ;;  %v646_v1 = vld [vmem:[%s857_s3 + $0x30] sm:$0xff]  ;;  %s861_s22 = smov (!%p224_p3, %s601_s22), 63  ;;  %v645_v2 = vld [vmem:[%s857_s3 + $0x28] sm:$0xff]  ;;  %s863_s19 = smov (!%p235_p4, %s726_s19), 3  ;;  %vm506_vm0 = vcmask 1040384  }
   0xc   : > { %383 = vmatpush.bf16.msra.mxu0 %v647_v0  ;;  %648 = vmatpush.bf16.msra.mxu1 %v647_v0  ;;  %s602_s27 = sshll.u32 %s861_s22, 3  ;;  %v644_v3 = vld [vmem:[%s857_s3 + $0x20] sm:$0xff]  ;;  %v643_v5 = vld [vmem:[%s857_s3 + $0x18] sm:$0xff]  ;;  %v642_v20 = vld [vmem:[%s857_s3 + $0x10] sm:$0xff]  ;;  %s605_s22 = sshll.u32 %s863_s19, 1 }
   0xd   : > { %649 = vmatpush.bf16.msra.mxu2 %v647_v0  ;;  %650 = vmatpush.bf16.msra.mxu3 %v647_v0  ;;  %s751_s7 = scalar_lea.vmem %s854_s0, %s602_s27  ;;  %v756_v4 = vld [vmem:[%s855_s1] ss:$0 sm:$0xff]  ;;  %v641_v29 = vld [vmem:[%s857_s3 + $0x8] sm:$0xff]  ;;  %s828_s25 = scalar_lea.vmem %s858_s4, %s602_s27 }
   0xe   : > { %v239_v6 = vld [vmem:[%s751_s7] sm:$0xff]  ;;  %v240_v7 = vld [vmem:[%s751_s7 + $0x8] sm:$0xff]  ;;  %v241_v44 = vld [vmem:[%s751_s7 + $0x10] sm:$0xff]  ;;  %s238_s28 = scalar_lea.vmem %s859_s5, %s605_s22 }
   0xf   : > { %v243_v8 = vld [vmem:[%s751_s7 + $0x20] sm:$0xff]  ;;  %v244_v9 = vld [vmem:[%s751_s7 + $0x28] sm:$0xff]  ;;  %v259_v14 = vmul.f32 %v756_v4, %v239_v6  ;;  %v260_v16 = vmul.f32 %v756_v4, %v240_v7  ;;  %v242_v45 = vld [vmem:[%s751_s7 + $0x18] sm:$0xff]  ;;  %v261_v54 = vmul.f32 %v756_v4, %v241_v44 }
  0x10   : > { %384 = vmatpush.bf16.msra.mxu0 %v646_v1  ;;  %651 = vmatpush.bf16.msra.mxu1 %v646_v1  ;;  %v247_v10 = vld [vmem:[%s751_s7 + $0x40] sm:$0xff]  ;;  %v248_v11 = vld [vmem:[%s751_s7 + $0x48] sm:$0xff]  ;;  %v263_v17 = vmul.f32 %v756_v4, %v243_v8  ;;  %v264_v18 = vmul.f32 %v756_v4, %v244_v9  ;;  %v245_v48 = vld [vmem:[%s751_s7 + $0x30] sm:$0xff]  ;;  %v262_v55 = vmul.f32 %v756_v4, %v242_v45 }
  0x11   : > { %652 = vmatpush.bf16.msra.mxu2 %v646_v1  ;;  %653 = vmatpush.bf16.msra.mxu3 %v646_v1  ;;  %v251_v12 = vld [vmem:[%s751_s7 + $0x60] sm:$0xff]  ;;  %v252_v13 = vld [vmem:[%s751_s7 + $0x68] sm:$0xff]  ;;  %v267_v19 = vmul.f32 %v756_v4, %v247_v10  ;;  %v268_v21 = vmul.f32 %v756_v4, %v248_v11  ;;  %v246_v49 = vld [vmem:[%s751_s7 + $0x38] sm:$0xff]  ;;  %v265_v56 = vmul.f32 %v756_v4, %v245_v48 }
  0x12   : > { %v773_v15 = vld [vmem:[%s856_s2] ss:$0 sm:$0xff]  ;;  %v271_v22 = vmul.f32 %v756_v4, %v251_v12  ;;  %v272_v23 = vmul.f32 %v756_v4, %v252_v13  ;;  %v249_v50 = vld [vmem:[%s751_s7 + $0x50] sm:$0xff]  ;;  %v250_v51 = vld [vmem:[%s751_s7 + $0x58] sm:$0xff]  ;;  %v266_v57 = vmul.f32 %v756_v4, %v246_v49 }
  0x13   : > { %v279_v24 = vadd.f32 %v773_v15, %v259_v14  ;;  %v280_v25 = vadd.f32 %v773_v15, %v260_v16  ;;  %v283_v26 = vadd.f32 %v773_v15, %v263_v17  ;;  %v284_v27 = vadd.f32 %v773_v15, %v264_v18  ;;  %v640_v37 = vld [vmem:[%s857_s3] sm:$0xff]  ;;  %v253_v52 = vld [vmem:[%s751_s7 + $0x70] sm:$0xff]  ;;  %v254_v53 = vld [vmem:[%s751_s7 + $0x78] sm:$0xff] }
  0x14   : > { %385 = vmatpush.bf16.msra.mxu0 %v645_v2  ;;  %654 = vmatpush.bf16.msra.mxu1 %v645_v2  ;;  %v287_v28 = vadd.f32 %v773_v15, %v267_v19  ;;  %v288_v30 = vadd.f32 %v773_v15, %v268_v21  ;;  %v291_v31 = vadd.f32 %v773_v15, %v271_v22 }
  0x15   : > { %655 = vmatpush.bf16.msra.mxu2 %v645_v2  ;;  %656 = vmatpush.bf16.msra.mxu3 %v645_v2  ;;  %v292_v32 = vadd.f32 %v773_v15, %v272_v23  ;;  %v295_v33 = vmax.f32 %v279_v24, 0.0  ;;  %v296_v34 = vmax.f32 %v280_v25, 0.0  ;;  %v299_v35 = vmax.f32 %v283_v26, 0.0 }
  0x16   : > { %v300_v36 = vmax.f32 %v284_v27, 0.0  ;;  %v303_v38 = vmax.f32 %v287_v28, 0.0  ;;  %v304_v39 = vmax.f32 %v288_v30, 0.0  ;;  %v307_v40 = vmax.f32 %v291_v31, 0.0 }
  0x17   : > { %v308_v41 = vmax.f32 %v292_v32, 0.0  ;;  %v311_v42 = vpack.c.bf16 %v296_v34, %v295_v33  ;;  %v269_v58 = vmul.f32 %v756_v4, %v249_v50  ;;  %v270_v59 = vmul.f32 %v756_v4, %v250_v51 }
  0x18   : > { %386 = vmatpush.bf16.msra.mxu0 %v644_v3  ;;  %657 = vmatpush.bf16.msra.mxu1 %v644_v3  ;;  %v313_v43 = vpack.c.bf16 %v300_v36, %v299_v35  ;;  %v315_v46 = vpack.c.bf16 %v304_v39, %v303_v38  ;;  %v273_v60 = vmul.f32 %v756_v4, %v253_v52 }
  0x19   : > { %658 = vmatpush.bf16.msra.mxu2 %v644_v3  ;;  %659 = vmatpush.bf16.msra.mxu3 %v644_v3  ;;  %v317_v47 = vpack.c.bf16 %v308_v41, %v307_v40  ;;  %v274_v61 = vmul.f32 %v756_v4, %v254_v53  ;;  %v281_v62 = vadd.f32 %v773_v15, %v261_v54 }
  0x1a   : > { %v282_v63 = vadd.f32 %v773_v15, %v262_v55  ;;  %v285_v0 = vadd.f32 %v773_v15, %v265_v56  ;;  %v286_v1 = vadd.f32 %v773_v15, %v266_v57  ;;  %v289_v2 = vadd.f32 %v773_v15, %v269_v58 }
  0x1b   : > { %v290_v3 = vadd.f32 %v773_v15, %v270_v59  ;;  %v294_v6 = vadd.f32 %v773_v15, %v274_v61  ;;  %v297_v7 = vmax.f32 %v281_v62, 0.0 }
  0x1c   : > { %387 = vmatpush.bf16.msra.mxu0 %v643_v5  ;;  %660 = vmatpush.bf16.msra.mxu1 %v643_v5  ;;  %v298_v8 = vmax.f32 %v282_v63, 0.0  ;;  %v301_v4 = vmax.f32 %v285_v0, 0.0  ;;  %v302_v9 = vmax.f32 %v286_v1, 0.0  ;;  %v305_v10 = vmax.f32 %v289_v2, 0.0 }
  0x1d   : > { %661 = vmatpush.bf16.msra.mxu2 %v643_v5  ;;  %662 = vmatpush.bf16.msra.mxu3 %v643_v5  ;;  %v293_v5 = vadd.f32 %v773_v15, %v273_v60  ;;  %v306_v11 = vmax.f32 %v290_v3, 0.0  ;;  %v310_v13 = vmax.f32 %v294_v6, 0.0 }
  0x1e   : > { %v312_v14 = vpack.c.bf16 %v298_v8, %v297_v7  ;;  %v314_v16 = vpack.c.bf16 %v302_v9, %v301_v4 }
  0x1f   : > { %v309_v12 = vmax.f32 %v293_v5, 0.0  ;;  %v316_v17 = vpack.c.bf16 %v306_v11, %v305_v10 }
  0x20   : > { %388 = vmatpush.bf16.msra.mxu0 %v642_v20  ;;  %663 = vmatpush.bf16.msra.mxu1 %v642_v20 }
  0x21   : > { %664 = vmatpush.bf16.msra.mxu2 %v642_v20  ;;  %665 = vmatpush.bf16.msra.mxu3 %v642_v20  ;;  %v318_v18 = vpack.c.bf16 %v310_v13, %v309_v12 }
  0x24   : > { %389 = vmatpush.bf16.msra.mxu0 %v641_v29  ;;  %666 = vmatpush.bf16.msra.mxu1 %v641_v29 }
  0x25   : > { %667 = vmatpush.bf16.msra.mxu2 %v641_v29  ;;  %668 = vmatpush.bf16.msra.mxu3 %v641_v29 }
  0x28   : > { %390 = vmatpush.bf16.msra.mxu0 %v640_v37  ;;  %669 = vmatpush.bf16.msra.mxu1 %v640_v37 }
  0x29   : > { %670 = vmatpush.bf16.msra.mxu2 %v640_v37  ;;  %671 = vmatpush.bf16.msra.mxu3 %v640_v37 }
  0x2b   : > { %391 = vmatmul.bf16.vlgmr.msra.gmra.mxu0 %v311_v42  ;;  %401 = vmatmul.bf16.vlgmr.msra.gmra.mxu1 %v313_v43 }
  0x2c   : > { %411 = vmatmul.bf16.vlgmr.msra.gmra.mxu2 %v315_v46  ;;  %421 = vmatmul.bf16.vlgmr.msra.gmra.mxu3 %v317_v47 }
  0x3b   : > { %396 = vmatmul.bf16.gmra.mxu0 %v312_v14  ;;  %406 = vmatmul.bf16.gmra.mxu1 %v314_v16 }
  0x3c   : > { %416 = vmatmul.bf16.gmra.mxu2 %v316_v17  ;;  %426 = vmatmul.bf16.gmra.mxu3 %v318_v18 }
  0xa8   : > { %v392_v15 = vpop.f32.mrf.mxu0  ;;  %v402_v19 = vpop.f32.mrf.mxu1 }
  0xa9   : > { %432 = vst [vmem:[%s828_s25] sm:$0xff] %v392_v15  ;;  %v469_v29 = vmul.f32 %v392_v15, %v392_v15  ;;  %v473_v41 = vmul.f32 %v402_v19, %v402_v19 }
  0xaa   : > { %436 = vst [vmem:[%s828_s25 + $0x20] sm:$0xff] %v402_v19 }
  0xaf   : > { %v412_v20 = vpop.f32.mrf.mxu2  ;;  %v422_v21 = vpop.f32.mrf.mxu3 }
  0xb0   : > { %v394_v22 = vpop.f32.mrf.mxu0  ;;  %v404_v23 = vpop.f32.mrf.mxu1  ;;  %440 = vst [vmem:[%s828_s25 + $0x40] sm:$0xff] %v412_v20  ;;  %v477_v55 = vmul.f32 %v412_v20, %v412_v20  ;;  %v481_v3 = vmul.f32 %v422_v21, %v422_v21 }
  0xb1   : > { %433 = vst [vmem:[%s828_s25 + $0x8] sm:$0xff] %v394_v22  ;;  %v470_v28 = vmul.f32 %v394_v22, %v394_v22  ;;  %v448_v30 = vadd.f32 %v394_v22, %v392_v15  ;;  %v474_v44 = vmul.f32 %v404_v23, %v404_v23 }
  0xb2   : > { %437 = vst [vmem:[%s828_s25 + $0x28] sm:$0xff] %v404_v23 }
  0xb3   : > { %444 = vst [vmem:[%s828_s25 + $0x60] sm:$0xff] %v422_v21  ;;  %v485_v32 = vadd.f32 %v470_v28, %v469_v29 }
  0xb7   : > { %v414_v24 = vpop.f32.mrf.mxu2  ;;  %v424_v25 = vpop.f32.mrf.mxu3 }
  0xb8   : > { %v397_v26 = vpop.f32.mrf.mxu0  ;;  %v407_v27 = vpop.f32.mrf.mxu1  ;;  %441 = vst [vmem:[%s828_s25 + $0x48] sm:$0xff] %v414_v24  ;;  %v478_v58 = vmul.f32 %v414_v24, %v414_v24  ;;  %v482_v7 = vmul.f32 %v424_v25, %v424_v25 }
  0xb9   : > { %434 = vst [vmem:[%s828_s25 + $0x10] sm:$0xff] %v397_v26  ;;  %v471_v31 = vmul.f32 %v397_v26, %v397_v26  ;;  %v449_v33 = vadd.f32 %v448_v30, %v397_v26  ;;  %v475_v47 = vmul.f32 %v407_v27, %v407_v27 }
  0xba   : > { %438 = vst [vmem:[%s828_s25 + $0x30] sm:$0xff] %v407_v27 }
  0xbb   : > { %445 = vst [vmem:[%s828_s25 + $0x68] sm:$0xff] %v424_v25  ;;  %v486_v38 = vadd.f32 %v485_v32, %v471_v31 }
  0xbf   : > { %v417_v34 = vpop.f32.mrf.mxu2  ;;  %v427_v35 = vpop.f32.mrf.mxu3 }
  0xc0   : > { %v399_v36 = vpop.f32.mrf.mxu0  ;;  %v409_v37 = vpop.f32.mrf.mxu1  ;;  %442 = vst [vmem:[%s828_s25 + $0x50] sm:$0xff] %v417_v34  ;;  %v479_v62 = vmul.f32 %v417_v34, %v417_v34  ;;  %v483_v10 = vmul.f32 %v427_v35, %v427_v35 }
  0xc1   : > { %435 = vst [vmem:[%s828_s25 + $0x18] sm:$0xff] %v399_v36  ;;  %v450_v39 = vadd.f32 %v449_v33, %v399_v36  ;;  %v472_v40 = vmul.f32 %v399_v36, %v399_v36  ;;  %v476_v53 = vmul.f32 %v409_v37, %v409_v37 }
  0xc2   : > { %439 = vst [vmem:[%s828_s25 + $0x38] sm:$0xff] %v409_v37 }
  0xc3   : > { %v451_v42 = vadd.f32 %v450_v39, %v402_v19  ;;  %v487_v43 = vadd.f32 %v486_v38, %v472_v40  ;;  %446 = vst [vmem:[%s828_s25 + $0x70] sm:$0xff] %v427_v35 }
  0xc5   : > { %v488_v45 = vadd.f32 %v487_v43, %v473_v41  ;;  %v452_v46 = vadd.f32 %v451_v42, %v404_v23 }
  0xc7   : > { %v453_v48 = vadd.f32 %v452_v46, %v407_v27  ;;  %v489_v49 = vadd.f32 %v488_v45, %v474_v44  ;;  %v419_v50 = vpop.f32.mrf.mxu2  ;;  %v429_v51 = vpop.f32.mrf.mxu3 }
  0xc8   : > { %443 = vst [vmem:[%s828_s25 + $0x58] sm:$0xff] %v419_v50  ;;  %v480_v2 = vmul.f32 %v419_v50, %v419_v50  ;;  %v484_v14 = vmul.f32 %v429_v51, %v429_v51 }
  0xc9   : > { %v454_v52 = vadd.f32 %v453_v48, %v409_v37  ;;  %v490_v54 = vadd.f32 %v489_v49, %v475_v47  ;;  %447 = vst [vmem:[%s828_s25 + $0x78] sm:$0xff] %v429_v51 }
  0xcb   : > { %v455_v56 = vadd.f32 %v454_v52, %v412_v20  ;;  %v491_v57 = vadd.f32 %v490_v54, %v476_v53 }
  0xcd   : > { %v492_v59 = vadd.f32 %v491_v57, %v477_v55  ;;  %v456_v60 = vadd.f32 %v455_v56, %v414_v24 }
  0xcf   : > { %v457_v61 = vadd.f32 %v456_v60, %v417_v34  ;;  %v493_v63 = vadd.f32 %v492_v59, %v478_v58 }
  0xd1   : > { %v494_v0 = vadd.f32 %v493_v63, %v479_v62  ;;  %v458_v1 = vadd.f32 %v457_v61, %v419_v50 }
  0xd3   : > { %v459_v5 = vadd.f32 %v458_v1, %v422_v21  ;;  %v495_v6 = vadd.f32 %v494_v0, %v480_v2 }
  0xd5   : > { %v496_v8 = vadd.f32 %v495_v6, %v481_v3  ;;  %v460_v4 = vadd.f32 %v459_v5, %v424_v25 }
  0xd7   : > { %v461_v9 = vadd.f32 %v460_v4, %v427_v35  ;;  %v497_v11 = vadd.f32 %v496_v8, %v482_v7 }
  0xd9   : > { %v498_v12 = vadd.f32 %v497_v11, %v483_v10  ;;  %v462_v13 = vadd.f32 %v461_v9, %v429_v51 }
  0xdb   : > { %v463_v16 = vrot.slane %v462_v13, 4  ;;  %v499_v17 = vadd.f32 %v498_v12, %v484_v14 }
  0xdd   : > { %v464_v18 = vadd.f32 %v463_v16, %v462_v13  ;;  %v500_v15 = vrot.slane %v499_v17, 4 }
  0xdf   : > { %v465_v19 = vrot.slane %v464_v18, 2  ;;  %v501_v20 = vadd.f32 %v500_v15, %v499_v17 }
  0xe1   : > { %v466_v21 = vadd.f32 %v465_v19, %v464_v18  ;;  %v502_v22 = vrot.slane %v501_v20, 2 }
  0xe3   : > { %v467_v23 = vrot.slane %v466_v21, 1  ;;  %v503_v24 = vadd.f32 %v502_v22, %v501_v20 }
  0xe5   : > { %v504_v25 = vrot.slane %v503_v24, 1  ;;  %v468_v26 = vadd.f32 %v467_v23, %v466_v21 }
  0xe7   : > { %v505_v27 = vadd.f32 %v504_v25, %v503_v24 }
  0xe9   : > { %v507_v28 = vsel %vm506_vm0, %v468_v26, %v505_v27 }
  0xea   : > { %508 = vst [vmem:[%s238_s28] sm:$0x3] %v507_v28 }
  0xeb PF: > { %s16_s18 = sadd.s32 1, %s688_s18  }
  0xec   : > { %p13_p5 = scmp.ge.s32.totalorder %s16_s18, 6  }
  0xee   :  { %15 = sbr.rel (!%p13_p5) target bundleno = 1 (0x1), region = 78 }

// kernel: bottleneck_forward.4
= control target key start
LH: loop header
LB: loop body
LE: loop exit
PB: predicated region body
PF: predicated region fallthrough
CT: control target
= control target key end

     0   :  { %s2424_s27 = smov 0   ;;  %s3105_s0 = inlined_call_operand.vmem [shape: f32[2,8,8,128], index: 0, kind: input, shape index: {}]   ;;  %s3106_s1 = inlined_call_operand.vmem [shape: f32[2,8,8,128], index: 1, kind: input, shape index: {}]   ;;  %s3107_s2 = inlined_call_operand.vmem [shape: f32[2,8,8,128], index: 2, kind: input, shape index: {}]   ;;  %s3108_s3 = inlined_call_operand.vmem [shape: f32[2,8,8,128], index: 3, kind: input, shape index: {}]   ;;  %s3109_s4 = inlined_call_operand.vmem [shape: f32[1,128], index: 4, kind: input, shape index: {}]   ;;  %s3110_s5 = inlined_call_operand.vmem [shape: f32[1,128], index: 5, kind: input, shape index: {}]   ;;  %s3111_s6 = inlined_call_operand.vmem [shape: bf16[9,128,128], index: 6, kind: input, shape index: {}]   ;;  %s3112_s7 = inlined_call_operand.vmem [shape: f32[2,8,8,128], index: 7, kind: output, shape index: {0}]   ;;  %s3113_s8 = inlined_call_operand.vmem [shape: f32[2,2,128], index: 8, kind: output, shape index: {1}]  }
   0x1 LB: > { %s1826_s28 = sadd.s32 4294967295, %s2376_s27   ;;  %p1830_p0 = scmp.ge.s32.totalorder %s2376_s27, 1  ;;  %s2376_s27 = sphi %s2424_s27, %s19_s27  }
   0x2   : > { %p295_p1 = scmp.lt.s32.totalorder %s2376_s27, 3 }
   0x4   : > { %p296_p2 = pnand %p1830_p0, %p295_p1 }
   0x5   : > { %p348_p3 = scmp.lt.s32.totalorder (!%p296_p2), %s1826_s28, 1 }
   0x6   : > { %299 = sbr.rel (%p296_p2) target bundleno = 353 (0x161), region = 48 }
   0xb   : > { %v2280_v0 = vld [vmem:[%s3111_s6 + $0xf8] sm:$0xff]  ;;  %v2378_v2 = vmov 0.0   ;;  %v2279_v3 = vld [vmem:[%s3111_s6 + $0xf0] sm:$0xff]  ;;  %s3115_s28 = smov (!%p348_p3, %s1826_s28), 1  ;;  %v2278_v6 = vld [vmem:[%s3111_s6 + $0xe8] sm:$0xff]  ;;  %vm1701_vm0 = vcmask 1040384  }
   0xc   : > { %v2288_v1 = vld [vmem:[%s3111_s6 + $0x178] sm:$0xff]  ;;  %427 = vst [vmem:[#allocation2 + $0x50] sm:$0xff] %v2378_v2  ;;  %2337 = vmatpush.bf16.msra.mxu1 %v2280_v0  ;;  %620 = vmatpush.bf16.msra.mxu0 %v2280_v0  ;;  %v2287_v4 = vld [vmem:[%s3111_s6 + $0x170] sm:$0xff]  ;;  %s2455_s19 = sshll.u32 %s3115_s28, 6  ;;  %v2286_v7 = vld [vmem:[%s3111_s6 + $0x168] sm:$0xff] }
   0xd   : > { %803 = vmatpush.bf16.msra.mxu2 %v2288_v1  ;;  %v2296_v5 = vld [vmem:[%s3111_s6 + $0x78] sm:$0xff]  ;;  %429 = vst [vmem:[#allocation2 + $0x60] sm:$0xff] %v2378_v2  ;;  %v2295_v8 = vld [vmem:[%s3111_s6 + $0x70] sm:$0xff]  ;;  %s2467_s26 = scalar_lea.vmem %s3105_s0, %s2455_s19  ;;  %s2473_s9 = scalar_lea.vmem %s3106_s1, %s2455_s19  ;;  %v2481_v11 = vld [vmem:[%s3109_s4] ss:$0 sm:$0xff] }
   0xe   : > { %985 = vmatpush.bf16.msra.mxu3 %v2296_v5  ;;  %418 = vst [vmem:[#allocation2 + $0x8] sm:$0x3] %v2378_v2  ;;  %v381_v9 = vld [vmem:[%s2467_s26 + $0x20] sm:$0xff]  ;;  %v382_v10 = vld [vmem:[%s2467_s26 + $0x28] sm:$0xff]  ;;  %v2276_v31 = vld [vmem:[%s3111_s6 + $0xd8] sm:$0xff]  ;;  %s2571_s22 = scalar_lea.vmem %s3107_s2, %s2455_s19  ;;  %s2801_s20 = scalar_lea.vmem %s3108_s3, %s2455_s19 }
   0xf   : > { %419 = vst [vmem:[#allocation2 + $0x10] sm:$0xff] %v2378_v2  ;;  %v2294_v12 = vld [vmem:[%s3111_s6 + $0x68] sm:$0xff]  ;;  %v2490_v13 = vld [vmem:[%s3110_s5] ss:$0 sm:$0xff]  ;;  %v393_v15 = vmul.f32 %v2481_v11, %v381_v9  ;;  %v394_v16 = vmul.f32 %v2481_v11, %v382_v10  ;;  %v2284_v32 = vld [vmem:[%s3111_s6 + $0x158] sm:$0xff]  ;;  %s3074_s24 = scalar_lea.vmem %s3112_s7, %s2455_s19  ;;  %s1841_s19 = sshll.u32 %s3115_s28, 1 }
  0x10   : > { %2338 = vmatpush.bf16.msra.mxu1 %v2279_v3  ;;  %621 = vmatpush.bf16.msra.mxu0 %v2279_v3  ;;  %v479_v14 = vld [vmem:[%s2473_s9 + $0x20] sm:$0xff]  ;;  %421 = vst [vmem:[#allocation2 + $0x20] sm:$0xff] %v2378_v2  ;;  %v480_v17 = vld [vmem:[%s2473_s9 + $0x28] sm:$0xff]  ;;  %v2275_v37 = vld [vmem:[%s3111_s6 + $0xd0] sm:$0xff] }
  0x11   : > { %804 = vmatpush.bf16.msra.mxu2 %v2287_v4  ;;  %v2500_v18 = vld [vmem:[%s3109_s4] ss:$0 sm:$0xff]  ;;  %423 = vst [vmem:[#allocation2 + $0x30] sm:$0xff] %v2378_v2  ;;  %v2512_v21 = vadd.f32 %v2490_v13, %v393_v15  ;;  %v2515_v22 = vadd.f32 %v2490_v13, %v394_v16  ;;  %v476_v36 = vld [vmem:[%s2473_s9 + $0x8] sm:$0xff]  ;;  %v2292_v38 = vld [vmem:[%s3111_s6 + $0x58] sm:$0xff] }
  0x12   : > { %986 = vmatpush.bf16.msra.mxu3 %v2295_v8  ;;  %v2506_v19 = vld [vmem:[%s3110_s5] ss:$0 sm:$0xff]  ;;  %v491_v23 = vmul.f32 %v2500_v18, %v479_v14  ;;  %v492_v25 = vmul.f32 %v2500_v18, %v480_v17  ;;  %425 = vst [vmem:[#allocation2 + $0x40] sm:$0xff] %v2378_v2  ;;  %v2283_v39 = vld [vmem:[%s3111_s6 + $0x150] sm:$0xff]  ;;  %v378_v41 = vld [vmem:[%s2467_s26 + $0x8] sm:$0xff]  ;;  %v488_v43 = vmul.f32 %v2500_v18, %v476_v36 }
  0x13   : > { %v2277_v20 = vld [vmem:[%s3111_s6 + $0xe0] sm:$0xff]  ;;  %v413_v26 = vmax.f32 %v2512_v21, 0.0  ;;  %v414_v27 = vmax.f32 %v2515_v22, 0.0  ;;  %v2291_v44 = vld [vmem:[%s3111_s6 + $0x50] sm:$0xff]  ;;  %v2274_v45 = vld [vmem:[%s3111_s6 + $0xc8] sm:$0xff]  ;;  %431 = vst [vmem:[#allocation2 + $0x70] sm:$0xff] %v2378_v2  ;;  %v390_v48 = vmul.f32 %v2481_v11, %v378_v41 }
  0x14   : > { %2339 = vmatpush.bf16.msra.mxu1 %v2278_v6  ;;  %622 = vmatpush.bf16.msra.mxu0 %v2278_v6  ;;  %v2285_v24 = vld [vmem:[%s3111_s6 + $0x160] sm:$0xff]  ;;  %v2525_v28 = vadd.f32 %v2506_v19, %v491_v23  ;;  %v2532_v30 = vadd.f32 %v2506_v19, %v492_v25  ;;  %v2282_v47 = vld [vmem:[%s3111_s6 + $0x148] sm:$0xff]  ;;  %433 = vst [vmem:[#allocation2 + $0x80] sm:$0xff] %v2378_v2  ;;  %v2272_v55 = vld [vmem:[%s3111_s6 + $0x138] sm:$0xff] }
  0x15   : > { %805 = vmatpush.bf16.msra.mxu2 %v2286_v7  ;;  %v2293_v29 = vld [vmem:[%s3111_s6 + $0x60] sm:$0xff]  ;;  %442 = vst [vmem:[#allocation2 + $0x51] sm:$0xff] %v413_v26  ;;  %v2595_v51 = vadd.f32 %v2506_v19, %v488_v43  ;;  %v2290_v53 = vld [vmem:[%s3111_s6 + $0x48] sm:$0xff]  ;;  %v2615_v59 = vadd.f32 %v2490_v13, %v390_v48  ;;  %v2304_v1 = vld [vmem:[%s3111_s6 + $0x1f8] sm:$0xff] }
  0x16   : > { %987 = vmatpush.bf16.msra.mxu3 %v2294_v12  ;;  %443 = vst [vmem:[#allocation2 + $0x61] sm:$0xff] %v414_v27  ;;  %v511_v33 = vmax.f32 %v2525_v28, 0.0  ;;  %v512_v34 = vmax.f32 %v2532_v30, 0.0  ;;  %v475_v35 = vld [vmem:[%s2473_s9] sm:$0xff]  ;;  %v383_v4 = vld [vmem:[%s2467_s26 + $0x30] sm:$0xff]  ;;  %v384_v7 = vld [vmem:[%s2467_s26 + $0x38] sm:$0xff] }
  0x17   : > { %525 = vst [vmem:[#allocation2 + $0x50] sm:$0xff] %v2378_v2  ;;  %v377_v40 = vld [vmem:[%s2467_s26] sm:$0xff]  ;;  %v487_v42 = vmul.f32 %v2500_v18, %v475_v35  ;;  %v508_v0 = vmax.f32 %v2595_v51, 0.0  ;;  %v2271_v8 = vld [vmem:[%s3111_s6 + $0x130] sm:$0xff]  ;;  %v410_v9 = vmax.f32 %v2615_v59, 0.0  ;;  %v395_v14 = vmul.f32 %v2481_v11, %v383_v4  ;;  %v2320_v17 = vld [vmem:[%s3111_s6 + $0xb8] sm:$0xff] }
  0x18   : > { %2340 = vmatpush.bf16.msra.mxu1 %v2277_v20  ;;  %623 = vmatpush.bf16.msra.mxu0 %v2277_v20  ;;  %527 = vst [vmem:[#allocation2 + $0x60] sm:$0xff] %v2378_v2  ;;  %v389_v46 = vmul.f32 %v2481_v11, %v377_v40  ;;  %v2588_v49 = vld [vmem:[%s3109_s4] ss:$0 sm:$0xff]  ;;  %v2303_v12 = vld [vmem:[%s3111_s6 + $0x1f0] sm:$0xff]  ;;  %v396_v16 = vmul.f32 %v2481_v11, %v384_v7  ;;  %v478_v23 = vld [vmem:[%s2473_s9 + $0x18] sm:$0xff] }
  0x19   : > { %806 = vmatpush.bf16.msra.mxu2 %v2285_v24  ;;  %539 = vst [vmem:[#allocation2 + $0x51] sm:$0xff] %v511_v33  ;;  %v2592_v50 = vadd.f32 %v2506_v19, %v487_v42  ;;  %v840_v52 = vld [vmem:[%s2571_s22] sm:$0xff]  ;;  %v477_v15 = vld [vmem:[%s2473_s9 + $0x10] sm:$0xff]  ;;  %v2270_v24 = vld [vmem:[%s3111_s6 + $0x128] sm:$0xff]  ;;  %v490_v35 = vmul.f32 %v2500_v18, %v478_v23 }
  0x1a   : > { %988 = vmatpush.bf16.msra.mxu3 %v2293_v29  ;;  %540 = vst [vmem:[#allocation2 + $0x61] sm:$0xff] %v512_v34  ;;  %v2273_v54 = vld [vmem:[%s3111_s6 + $0xc0] sm:$0xff]  ;;  %v2608_v56 = vadd.f32 %v2490_v13, %v389_v46  ;;  %v852_v60 = vmul.f32 %v2588_v49, %v840_v52  ;;  %v2302_v29 = vld [vmem:[%s3111_s6 + $0x1e8] sm:$0xff]  ;;  %v2670_v36 = vadd.f32 %v2490_v13, %v396_v16  ;;  %v481_v40 = vld [vmem:[%s2473_s9 + $0x30] sm:$0xff] }
  0x1b   : > { %516 = vst [vmem:[#allocation2 + $0x8] sm:$0x3] %v2378_v2  ;;  %v2281_v58 = vld [vmem:[%s3111_s6 + $0x140] sm:$0xff]  ;;  %v507_v63 = vmax.f32 %v2592_v50, 0.0  ;;  %v482_v43 = vld [vmem:[%s2473_s9 + $0x38] sm:$0xff]  ;;  %v2688_v46 = vadd.f32 %v2506_v19, %v490_v35  ;;  %v379_v50 = vld [vmem:[%s2467_s26 + $0x10] sm:$0xff]  ;;  %v493_v52 = vmul.f32 %v2500_v18, %v481_v40  ;;  %s376_s9 = scalar_lea.vmem %s3113_s8, %s1841_s19 }
  0x1c   : > { %2341 = vmatpush.bf16.msra.mxu1 %v2276_v31  ;;  %624 = vmatpush.bf16.msra.mxu0 %v2276_v31  ;;  %v2621_v61 = vld [vmem:[%s3110_s5] ss:$0 sm:$0xff]  ;;  %880 = vst [vmem:[#allocation2] sm:$0xff] %v2378_v2  ;;  %v409_v5 = vmax.f32 %v2608_v56, 0.0  ;;  %v2665_v31 = vadd.f32 %v2490_v13, %v395_v14  ;;  %v416_v48 = vmax.f32 %v2670_v36, 0.0  ;;  %v842_v51 = vld [vmem:[%s2571_s22 + $0x10] sm:$0xff] }
  0x1d   : > { %807 = vmatpush.bf16.msra.mxu2 %v2284_v32  ;;  %881 = vst [vmem:[#allocation2 + $0x8] sm:$0x3] %v2378_v2  ;;  %v734_v6 = vpack.c.bf16 %v508_v0, %v507_v63  ;;  %v864_v10 = vadd.f32 %v2621_v61, %v852_v60  ;;  %v2289_v20 = vld [vmem:[%s3111_s6 + $0x40] sm:$0xff]  ;;  %v489_v32 = vmul.f32 %v2500_v18, %v477_v15  ;;  %v2328_v60 = vld [vmem:[%s3111_s6 + $0x1b8] sm:$0xff]  ;;  %v2299_v15 = vld [vmem:[%s3111_s6 + $0x1d0] sm:$0xff] }
  0x1e   : > { %989 = vmatpush.bf16.msra.mxu3 %v2292_v38  ;;  %438 = vst [vmem:[#allocation2 + $0x11] sm:$0xff] %v409_v5  ;;  %v415_v42 = vmax.f32 %v2665_v31, 0.0  ;;  %v2318_v23 = vld [vmem:[%s3111_s6 + $0xa8] sm:$0xff]  ;;  %v2265_v40 = vld [vmem:[%s3111_s6 + $0x100] sm:$0xff]  ;;  %v2315_v21 = vld [vmem:[%s3111_s6 + $0x90] sm:$0xff] }
  0x1f   : > { %439 = vst [vmem:[#allocation2 + $0x21] sm:$0xff] %v410_v9  ;;  %v2658_v25 = vmax.f32 %v864_v10, 0.0  ;;  %v2298_v35 = vld [vmem:[%s3111_s6 + $0x1c8] sm:$0xff]  ;;  %v2888_v22 = vld [vmem:[%s3111_s6 + $0x230] sm:$0xff] }
  0x20   : > { %2342 = vmatpush.bf16.msra.mxu1 %v2275_v37  ;;  %625 = vmatpush.bf16.msra.mxu0 %v2275_v37  ;;  %v547_v57 = vld [vmem:[#allocation2 + $0x50] sm:$0xff]  ;;  %517 = vst [vmem:[#allocation2 + $0x10] sm:$0xff] %v2378_v2  ;;  %v841_v37 = vld [vmem:[%s2571_s22 + $0x8] sm:$0xff] }
  0x21   : > { %808 = vmatpush.bf16.msra.mxu2 %v2283_v39  ;;  %v548_v62 = vld [vmem:[#allocation2 + $0x60] sm:$0xff]  ;;  %519 = vst [vmem:[#allocation2 + $0x20] sm:$0xff] %v2378_v2  ;;  %v2310_v30 = vld [vmem:[%s3111_s6 + $0x28] sm:$0xff] }
  0x22   : > { %990 = vmatpush.bf16.msra.mxu3 %v2291_v44  ;;  %v553_v3 = vpack.c.bf16 %v548_v62, %v547_v57  ;;  %v2269_v39 = vld [vmem:[%s3111_s6 + $0x120] sm:$0xff]  ;;  %535 = vst [vmem:[#allocation2 + $0x11] sm:$0xff] %v507_v63  ;;  %v494_v57 = vmul.f32 %v2500_v18, %v482_v43  ;;  %v391_v62 = vmul.f32 %v2481_v11, %v379_v50  ;;  %v2300_v18 = vld [vmem:[%s3111_s6 + $0x1d8] sm:$0xff]  ;;  %v2322_v36 = vld [vmem:[%s3111_s6 + $0x188] sm:$0xff] }
  0x23   : > { %v2301_v44 = vld [vmem:[%s3111_s6 + $0x1e0] sm:$0xff]  ;;  %536 = vst [vmem:[#allocation2 + $0x21] sm:$0xff] %v508_v0  ;;  %v510_v0 = vmax.f32 %v2688_v46, 0.0  ;;  %v2312_v43 = vld [vmem:[%s3111_s6 + $0x38] sm:$0xff] }
  0x24   : > { %2343 = vmatpush.bf16.msra.mxu1 %v2274_v45  ;;  %626 = vmatpush.bf16.msra.mxu0 %v2274_v45  ;;  %v908_v38 = vld [vmem:[#allocation2 + $0x1] sm:$0xff]  ;;  %v2685_v45 = vadd.f32 %v2506_v19, %v489_v32  ;;  %444 = vst [vmem:[#allocation2 + $0x71] sm:$0xff] %v415_v42  ;;  %v2729_v10 = vadd.f32 %v2506_v19, %v494_v57 }
  0x25   : > { %809 = vmatpush.bf16.msra.mxu2 %v2282_v47  ;;  %v916_v41 = vpack.c.bf16 %v2658_v25, %v908_v38  ;;  %v853_v47 = vmul.f32 %v2588_v49, %v841_v37  ;;  %445 = vst [vmem:[#allocation2 + $0x81] sm:$0xff] %v416_v48  ;;  %v2736_v14 = vadd.f32 %v2490_v13, %v391_v62  ;;  %v843_v38 = vld [vmem:[%s2571_s22 + $0x18] sm:$0xff]  ;;  %v844_v50 = vld [vmem:[%s2571_s22 + $0x20] sm:$0xff]  ;;  %v1137_v62 = vld [vmem:[%s2801_s20 + $0x8] sm:$0xff] }
  0x26   : > { %991 = vmatpush.bf16.msra.mxu3 %v2290_v53  ;;  %v380_v53 = vld [vmem:[%s2467_s26 + $0x18] sm:$0xff]  ;;  %v509_v63 = vmax.f32 %v2685_v45, 0.0  ;;  %529 = vst [vmem:[#allocation2 + $0x70] sm:$0xff] %v2378_v2 }
  0x27   : > { %531 = vst [vmem:[#allocation2 + $0x80] sm:$0xff] %v2378_v2  ;;  %v411_v32 = vmax.f32 %v2736_v14, 0.0 }
  0x28   : > { %2344 = vmatpush.bf16.msra.mxu1 %v2273_v54  ;;  %627 = vmatpush.bf16.msra.mxu0 %v2273_v54  ;;  %v854_v54 = vmul.f32 %v2588_v49, %v842_v51  ;;  %v735_v7 = vpack.c.bf16 %v510_v0, %v509_v63  ;;  %v856_v51 = vmul.f32 %v2588_v49, %v844_v50 }
  0x29   : > { %810 = vmatpush.bf16.msra.mxu2 %v2281_v58  ;;  %v2268_v58 = vld [vmem:[%s3111_s6 + $0x118] sm:$0xff]  ;;  %440 = vst [vmem:[#allocation2 + $0x31] sm:$0xff] %v411_v32 }
  0x2a   : > { %992 = vmatpush.bf16.msra.mxu3 %v2289_v20  ;;  %v866_v4 = vadd.f32 %v2621_v61, %v854_v54  ;;  %521 = vst [vmem:[#allocation2 + $0x30] sm:$0xff] %v2378_v2  ;;  %v2311_v54 = vld [vmem:[%s3111_s6 + $0x30] sm:$0xff]  ;;  %v868_v57 = vadd.f32 %v2621_v61, %v856_v51  ;;  %v454_v51 = vpack.c.bf16 %v410_v9, %v409_v5 }
  0x2b   : > { %638 = vmatmul.bf16.vlgmr.msra.gmra.mxu1 %v553_v3  ;;  %v392_v3 = vmul.f32 %v2481_v11, %v380_v53  ;;  %v2267_v11 = vld [vmem:[%s3111_s6 + $0x110] sm:$0xff]  ;;  %537 = vst [vmem:[#allocation2 + $0x31] sm:$0xff] %v509_v63 }
  0x2c   : > { %697 = vmatpush.bf16.msrb.mxu1 %v2272_v55  ;;  %1099 = vmatpush.bf16.msrb.mxu0 %v2304_v1  ;;  %v2319_v55 = vld [vmem:[%s3111_s6 + $0xb0] sm:$0xff]  ;;  %v865_v1 = vadd.f32 %v2621_v61, %v853_v47  ;;  %v2747_v20 = vmax.f32 %v866_v4, 0.0  ;;  %v1136_v4 = vld [vmem:[%s2801_s20] sm:$0xff]  ;;  %1176 = vst [vmem:[#allocation2] sm:$0xff] %v2378_v2  ;;  %v2830_v28 = vmax.f32 %v868_v57, 0.0 }
  0x2d   : > { %811 = vmatmul.bf16.vlgmr.msra.gmra.mxu2 %v734_v6  ;;  %993 = vmatmul.bf16.vlgmr.msra.gmra.mxu3 %v916_v41  ;;  %v2721_v6 = vadd.f32 %v2506_v19, %v493_v52  ;;  %v2745_v19 = vadd.f32 %v2490_v13, %v392_v3  ;;  %v2266_v13 = vld [vmem:[%s3111_s6 + $0x108] sm:$0xff]  ;;  %v855_v41 = vmul.f32 %v2588_v49, %v843_v38  ;;  %v2327_v47 = vld [vmem:[%s3111_s6 + $0x1b0] sm:$0xff]  ;;  %v2317_v52 = vld [vmem:[%s3111_s6 + $0xa0] sm:$0xff] }
  0x2e   : > { %1394 = vmatpush.bf16.msrb.mxu2 %v2320_v17  ;;  %1508 = vmatpush.bf16.msrb.mxu3 %v2328_v60  ;;  %v2741_v17 = vmax.f32 %v865_v1, 0.0  ;;  %v736_v1 = vpack.c.bf16 %v512_v34, %v511_v33  ;;  %1177 = vst [vmem:[#allocation2 + $0x8] sm:$0x3] %v2378_v2  ;;  %v2316_v33 = vld [vmem:[%s3111_s6 + $0x98] sm:$0xff]  ;;  %v1138_v38 = vld [vmem:[%s2801_s20 + $0x10] sm:$0xff]  ;;  %v2313_v57 = vld [vmem:[%s3111_s6 + $0x80] sm:$0xff] }
  0x2f   : > { %v412_v37 = vmax.f32 %v2745_v19, 0.0  ;;  %v867_v53 = vadd.f32 %v2621_v61, %v855_v41  ;;  %v2841_v34 = vld [vmem:[%s3111_s6 + $0x238] sm:$0xff]  ;;  %890 = vst [vmem:[#allocation2 + $0x50] sm:$0xff] %v2378_v2  ;;  %v2306_v19 = vld [vmem:[%s3111_s6 + $0x8] sm:$0xff] }
  0x30   : > { %698 = vmatpush.bf16.msrb.mxu1 %v2271_v8  ;;  %1100 = vmatpush.bf16.msrb.mxu0 %v2303_v12  ;;  %v543_v8 = vld [vmem:[#allocation2 + $0x10] sm:$0xff]  ;;  %v544_v12 = vld [vmem:[#allocation2 + $0x20] sm:$0xff]  ;;  %892 = vst [vmem:[#allocation2 + $0x60] sm:$0xff] %v2378_v2 }
  0x31   : > { %882 = vst [vmem:[#allocation2 + $0x10] sm:$0xff] %v2378_v2  ;;  %v551_v16 = vpack.c.bf16 %v544_v12, %v543_v8  ;;  %v2826_v45 = vmax.f32 %v867_v53, 0.0 }
  0x32   : > { %1395 = vmatpush.bf16.msrb.mxu2 %v2319_v55  ;;  %884 = vst [vmem:[#allocation2 + $0x20] sm:$0xff] %v2378_v2  ;;  %1509 = vmatpush.bf16.msrb.mxu3 %v2327_v47  ;;  %v2309_v47 = vld [vmem:[%s3111_s6 + $0x20] sm:$0xff] }
  0x33   : > { %900 = vst [vmem:[#allocation2 + $0x11] sm:$0xff] %v2658_v25  ;;  %628 = vmatmul.bf16.vlgmr.msra.gmra.mxu0 %v551_v16  ;;  %v918_v12 = vpack.c.bf16 %v2830_v28, %v2826_v45 }
  0x34   : > { %699 = vmatpush.bf16.msrb.mxu1 %v2270_v24  ;;  %1101 = vmatpush.bf16.msrb.mxu0 %v2302_v29  ;;  %v513_v24 = vmax.f32 %v2721_v6, 0.0  ;;  %901 = vst [vmem:[#allocation2 + $0x21] sm:$0xff] %v2741_v17  ;;  %v514_v29 = vmax.f32 %v2729_v10, 0.0  ;;  %v2314_v6 = vld [vmem:[%s3111_s6 + $0x88] sm:$0xff] }
  0x35   : > { %441 = vst [vmem:[#allocation2 + $0x41] sm:$0xff] %v412_v37  ;;  %v2334_v10 = vld [vmem:[%s3111_s6 + $0x228] sm:$0xff] }
  0x36   : > { %1396 = vmatpush.bf16.msrb.mxu2 %v2318_v23  ;;  %541 = vst [vmem:[#allocation2 + $0x71] sm:$0xff] %v513_v24  ;;  %v737_v56 = vpack.c.bf16 %v514_v29, %v513_v24  ;;  %v1317_v31 = vld [vmem:[#allocation2 + $0x1] sm:$0xff] }
  0x37   : > { %542 = vst [vmem:[#allocation2 + $0x81] sm:$0xff] %v514_v29  ;;  %v847_v29 = vld [vmem:[%s2571_s22 + $0x38] sm:$0xff] }
  0x38   : > { %700 = vmatpush.bf16.msrb.mxu1 %v2269_v39  ;;  %1102 = vmatpush.bf16.msrb.mxu0 %v2301_v44  ;;  %v917_v39 = vpack.c.bf16 %v2747_v20, %v2741_v17  ;;  %v2297_v44 = vld [vmem:[%s3111_s6 + $0x1c0] sm:$0xff]  ;;  %523 = vst [vmem:[#allocation2 + $0x40] sm:$0xff] %v2378_v2 }
  0x39   : > { %538 = vst [vmem:[#allocation2 + $0x41] sm:$0xff] %v510_v0  ;;  %v2847_v0 = vld [vmem:[%s3110_s5] ss:$0 sm:$0xff] }
  0x3a   : > { %1397 = vmatpush.bf16.msrb.mxu2 %v2317_v52  ;;  %1178 = vst [vmem:[#allocation2 + $0x10] sm:$0xff] %v2378_v2 }
  0x3b   : > { %1180 = vst [vmem:[#allocation2 + $0x20] sm:$0xff] %v2378_v2 }
  0x3c   : > { %701 = vmatpush.bf16.msrb.mxu1 %v2268_v58  ;;  %1103 = vmatpush.bf16.msrb.mxu0 %v2300_v18  ;;  %v2326_v58 = vld [vmem:[%s3111_s6 + $0x1a8] sm:$0xff]  ;;  %v2816_v18 = vld [vmem:[%s3109_s4] ss:$0 sm:$0xff]  ;;  %904 = vst [vmem:[#allocation2 + $0x51] sm:$0xff] %v2830_v28 }
  0x3d   : > { %816 = vmatmul.bf16.gmra.mxu2 %v735_v7  ;;  %998 = vmatmul.bf16.gmra.mxu3 %v917_v39  ;;  %v549_v55 = vld [vmem:[#allocation2 + $0x70] sm:$0xff]  ;;  %v1149_v63 = vmul.f32 %v2816_v18, %v1137_v62  ;;  %v1148_v46 = vmul.f32 %v2816_v18, %v1136_v4  ;;  %v2325_v39 = vld [vmem:[%s3111_s6 + $0x1a0] sm:$0xff]  ;;  %v859_v62 = vmul.f32 %v2588_v49, %v847_v29 }
  0x3e   : > { %v550_v60 = vld [vmem:[#allocation2 + $0x80] sm:$0xff]  ;;  %1510 = vmatpush.bf16.msrb.mxu3 %v2326_v58  ;;  %1398 = vmatpush.bf16.msrb.mxu2 %v2316_v33  ;;  %v545_v7 = vld [vmem:[#allocation2 + $0x30] sm:$0xff]  ;;  %v1030_v58 = vpack.c.bf16 %v2741_v17, %v2658_v25  ;;  %v1141_v17 = vld [vmem:[%s2801_s20 + $0x28] sm:$0xff]  ;;  %894 = vst [vmem:[#allocation2 + $0x70] sm:$0xff] %v2378_v2 }
  0x3f   : > { %v554_v3 = vpack.c.bf16 %v550_v60, %v549_v55  ;;  %v1161_v8 = vadd.f32 %v2847_v0, %v1149_v63  ;;  %886 = vst [vmem:[#allocation2 + $0x30] sm:$0xff] %v2378_v2  ;;  %v1160_v16 = vadd.f32 %v2847_v0, %v1148_v46  ;;  %v2308_v55 = vld [vmem:[%s3111_s6 + $0x18] sm:$0xff]  ;;  %v2946_v25 = vadd.f32 %v2621_v61, %v859_v62  ;;  %v2323_v4 = vld [vmem:[%s3111_s6 + $0x190] sm:$0xff] }
  0x40   : > { %702 = vmatpush.bf16.msrb.mxu1 %v2267_v11  ;;  %1104 = vmatpush.bf16.msrb.mxu0 %v2299_v15  ;;  %v845_v11 = vld [vmem:[%s2571_s22 + $0x28] sm:$0xff]  ;;  %v546_v15 = vld [vmem:[#allocation2 + $0x40] sm:$0xff]  ;;  %902 = vst [vmem:[#allocation2 + $0x31] sm:$0xff] %v2747_v20  ;;  %v2957_v63 = vpack.c.bf16 %v416_v48, %v415_v42  ;;  %v2307_v33 = vld [vmem:[%s3111_s6 + $0x10] sm:$0xff]  ;;  %v455_v42 = vpack.c.bf16 %v412_v37, %v411_v32 }
  0x41   : > { %643 = vmatmul.bf16.gmra.mxu1 %v554_v3  ;;  %v552_v23 = vpack.c.bf16 %v546_v15, %v545_v7  ;;  %888 = vst [vmem:[#allocation2 + $0x40] sm:$0xff] %v2378_v2  ;;  %v2873_v41 = vmax.f32 %v1160_v16, 0.0  ;;  %v879_v48 = vmax.f32 %v2946_v25, 0.0  ;;  %v2332_v32 = vld [vmem:[%s3111_s6 + $0x218] sm:$0xff]  ;;  %v2321_v37 = vld [vmem:[%s3111_s6 + $0x180] sm:$0xff] }
  0x42   : > { %903 = vst [vmem:[#allocation2 + $0x41] sm:$0xff] %v2826_v45  ;;  %1511 = vmatpush.bf16.msrb.mxu3 %v2325_v39  ;;  %1399 = vmatpush.bf16.msrb.mxu2 %v2315_v21  ;;  %v2305_v39 = vld [vmem:[%s3111_s6] sm:$0xff] }
  0x43   : > { %633 = vmatmul.bf16.gmra.mxu0 %v552_v23  ;;  %1196 = vst [vmem:[#allocation2 + $0x11] sm:$0xff] %v2873_v41 }
  0x44   : > { %703 = vmatpush.bf16.msrb.mxu1 %v2266_v13  ;;  %1105 = vmatpush.bf16.msrb.mxu0 %v2298_v35  ;;  %v857_v13 = vmul.f32 %v2588_v49, %v845_v11  ;;  %v2861_v35 = vmax.f32 %v1161_v8, 0.0  ;;  %1182 = vst [vmem:[#allocation2 + $0x30] sm:$0xff] %v2378_v2  ;;  %v1325_v8 = vpack.c.bf16 %v2873_v41, %v1317_v31 }
  0x45   : > { %1184 = vst [vmem:[#allocation2 + $0x40] sm:$0xff] %v2378_v2 }
  0x46   : > { %1197 = vst [vmem:[#allocation2 + $0x21] sm:$0xff] %v2861_v35  ;;  %1400 = vmatpush.bf16.msrb.mxu2 %v2314_v6 }
  0x47   : > { %896 = vst [vmem:[#allocation2 + $0x80] sm:$0xff] %v2378_v2 }
  0x48   : > { %704 = vmatpush.bf16.msrb.mxu1 %v2265_v40  ;;  %1106 = vmatpush.bf16.msrb.mxu0 %v2297_v44  ;;  %v2871_v40 = vpack.c.bf16 %v414_v27, %v413_v26  ;;  %v846_v44 = vld [vmem:[%s2571_s22 + $0x30] sm:$0xff]  ;;  %v2324_v26 = vld [vmem:[%s3111_s6 + $0x198] sm:$0xff]  ;;  %v869_v27 = vadd.f32 %v2621_v61, %v857_v13  ;;  %907 = vst [vmem:[#allocation2 + $0x81] sm:$0xff] %v879_v48 }
  0x49   : > { %v858_v50 = vmul.f32 %v2588_v49, %v846_v44  ;;  %1512 = vmatpush.bf16.msrb.mxu3 %v2324_v26  ;;  %v1140_v49 = vld [vmem:[%s2801_s20 + $0x20] sm:$0xff]  ;;  %1186 = vst [vmem:[#allocation2 + $0x50] sm:$0xff] %v2378_v2  ;;  %v1142_v13 = vld [vmem:[%s2801_s20 + $0x30] sm:$0xff]  ;;  %v1553_v26 = vpack.c.bf16 %v2861_v35, %v2873_v41 }
  0x4a   : > { %v2909_v59 = vmax.f32 %v869_v27, 0.0  ;;  %1401 = vmatpush.bf16.msrb.mxu2 %v2313_v57  ;;  %v1431_v15 = vld [vmem:[#allocation2 + $0x10] sm:$0xff]  ;;  %1192 = vst [vmem:[#allocation2 + $0x80] sm:$0xff] %v2378_v2 }
  0x4b   : > { %v870_v53 = vadd.f32 %v2621_v61, %v858_v50  ;;  %v1153_v61 = vmul.f32 %v2816_v18, %v1141_v17  ;;  %v2330_v50 = vld [vmem:[%s3111_s6 + $0x208] sm:$0xff] }
  0x4c   : > { %1280 = vmatpush.bf16.msra.mxu1 %v2312_v43  ;;  %1622 = vmatpush.bf16.msra.mxu0 %v2841_v34  ;;  %v1139_v43 = vld [vmem:[%s2801_s20 + $0x18] sm:$0xff]  ;;  %905 = vst [vmem:[#allocation2 + $0x61] sm:$0xff] %v2909_v59 }
  0x4d   : > { %821 = vmatmul.bf16.gmra.mxu2 %v736_v1  ;;  %1003 = vmatmul.bf16.gmra.mxu3 %v918_v12  ;;  %v1151_v52 = vmul.f32 %v2816_v18, %v1139_v43  ;;  %v2913_v9 = vmax.f32 %v870_v53, 0.0  ;;  %v1165_v46 = vadd.f32 %v2847_v0, %v1153_v61  ;;  %1188 = vst [vmem:[#allocation2 + $0x60] sm:$0xff] %v2378_v2  ;;  %v1432_v16 = vld [vmem:[#allocation2 + $0x20] sm:$0xff]  ;;  %v2331_v43 = vld [vmem:[%s3111_s6 + $0x210] sm:$0xff] }
  0x4e   : > { %2345 = vmatpush.bf16.msra.mxu2 %v2841_v34  ;;  %v2333_v34 = vld [vmem:[%s3111_s6 + $0x220] sm:$0xff]  ;;  %1513 = vmatpush.bf16.msrb.mxu3 %v2323_v4  ;;  %v1031_v12 = vpack.c.bf16 %v2826_v45, %v2747_v20  ;;  %v1439_v23 = vpack.c.bf16 %v1432_v16, %v1431_v15  ;;  %v1154_v20 = vmul.f32 %v2816_v18, %v1142_v13 }
  0x4f   : > { %v1163_v5 = vadd.f32 %v2847_v0, %v1151_v52  ;;  %v919_v1 = vpack.c.bf16 %v2913_v9, %v2909_v59  ;;  %906 = vst [vmem:[#allocation2 + $0x71] sm:$0xff] %v2913_v9  ;;  %v2985_v14 = vmax.f32 %v1165_v46, 0.0  ;;  %v1032_v52 = vpack.c.bf16 %v2909_v59, %v2830_v28 }
  0x50   : > { %1281 = vmatpush.bf16.msra.mxu1 %v2311_v54  ;;  %1623 = vmatpush.bf16.msra.mxu0 %v2888_v22  ;;  %v1150_v54 = vmul.f32 %v2816_v18, %v1138_v38  ;;  %1190 = vst [vmem:[#allocation2 + $0x70] sm:$0xff] %v2378_v2  ;;  %v1143_v38 = vld [vmem:[%s2801_s20 + $0x38] sm:$0xff]  ;;  %v1166_v44 = vadd.f32 %v2847_v0, %v1154_v20 }
  0x51   : > { %705 = vmatmul.bf16.vlgmr.msrb.gmra.mxu1 %v454_v51  ;;  %v2934_v60 = vmax.f32 %v1163_v5, 0.0  ;;  %1201 = vst [vmem:[#allocation2 + $0x61] sm:$0xff] %v2985_v14  ;;  %v1155_v45 = vmul.f32 %v2816_v18, %v1143_v38  ;;  %v1212_v59 = vpack.c.bf16 %v1431_v15, %v2378_v2 }
  0x52   : > { %v1162_v24 = vadd.f32 %v2847_v0, %v1150_v54  ;;  %2346 = vmatpush.bf16.msra.mxu2 %v2888_v22  ;;  %1514 = vmatpush.bf16.msrb.mxu3 %v2322_v36  ;;  %v1174_v21 = vmax.f32 %v1166_v44, 0.0 }
  0x53   : > { %1107 = vmatmul.bf16.vlgmr.msrb.gmra.mxu0 %v1030_v58  ;;  %1199 = vst [vmem:[#allocation2 + $0x41] sm:$0xff] %v2934_v60 }
  0x54   : > { %1282 = vmatpush.bf16.msra.mxu1 %v2310_v30  ;;  %1624 = vmatpush.bf16.msra.mxu0 %v2334_v10  ;;  %v2939_v3 = vmax.f32 %v1162_v24, 0.0  ;;  %v1152_v30 = vmul.f32 %v2816_v18, %v1140_v49  ;;  %1202 = vst [vmem:[#allocation2 + $0x71] sm:$0xff] %v1174_v21  ;;  %v1328_v5 = vpack.c.bf16 %v1174_v21, %v2985_v14 }
  0x56   : > { %1198 = vst [vmem:[#allocation2 + $0x31] sm:$0xff] %v2939_v3  ;;  %v1164_v7 = vadd.f32 %v2847_v0, %v1152_v30  ;;  %2347 = vmatpush.bf16.msra.mxu2 %v2334_v10  ;;  %1515 = vmatpush.bf16.msrb.mxu3 %v2321_v37  ;;  %v1326_v18 = vpack.c.bf16 %v2939_v3, %v2861_v35 }
  0x57   : > { %v1554_v35 = vpack.c.bf16 %v2934_v60, %v2939_v3 }
  0x58   : > { %1283 = vmatpush.bf16.msra.mxu1 %v2309_v47  ;;  %1625 = vmatpush.bf16.msra.mxu0 %v2333_v34  ;;  %v2996_v11 = vmax.f32 %v1164_v7, 0.0  ;;  %v1167_v47 = vadd.f32 %v2847_v0, %v1155_v45  ;;  %v2329_v0 = vld [vmem:[%s3111_s6 + $0x200] sm:$0xff] }
  0x59   : > { %v1436_v54 = vld [vmem:[#allocation2 + $0x60] sm:$0xff] }
  0x5a   : > { %1200 = vst [vmem:[#allocation2 + $0x51] sm:$0xff] %v2996_v11  ;;  %2348 = vmatpush.bf16.msra.mxu2 %v2333_v34  ;;  %v1175_v22 = vmax.f32 %v1167_v47, 0.0  ;;  %v1434_v51 = vld [vmem:[#allocation2 + $0x40] sm:$0xff] }
  0x5b   : > { %v1437_v6 = vld [vmem:[#allocation2 + $0x70] sm:$0xff] }
  0x5c   : > { %1284 = vmatpush.bf16.msra.mxu1 %v2308_v55  ;;  %1626 = vmatpush.bf16.msra.mxu0 %v2332_v32  ;;  %1203 = vst [vmem:[#allocation2 + $0x81] sm:$0xff] %v1175_v22  ;;  %v1555_v55 = vpack.c.bf16 %v2985_v14, %v2996_v11  ;;  %v1556_v57 = vpack.c.bf16 %v1175_v22, %v1174_v21 }
  0x5d   : > { %826 = vmatmul.bf16.gmra.mxu2 %v737_v56  ;;  %1008 = vmatmul.bf16.gmra.mxu3 %v919_v1  ;;  %v1433_v27 = vld [vmem:[#allocation2 + $0x30] sm:$0xff]  ;;  %v1033_v56 = vpack.c.bf16 %v879_v48, %v2913_v9  ;;  %v1215_v17 = vpack.c.bf16 %v1437_v6, %v1436_v54 }
  0x5e   : > { %2349 = vmatpush.bf16.msra.mxu2 %v2332_v32  ;;  %v1440_v53 = vpack.c.bf16 %v1434_v51, %v1433_v27  ;;  %v1213_v29 = vpack.c.bf16 %v1433_v27, %v1432_v16 }
  0x60   : > { %1285 = vmatpush.bf16.msra.mxu1 %v2307_v33  ;;  %1627 = vmatpush.bf16.msra.mxu0 %v2331_v43 }
  0x61   : > { %710 = vmatmul.bf16.gmra.mxu1 %v455_v42  ;;  %v1435_v41 = vld [vmem:[#allocation2 + $0x50] sm:$0xff] }
  0x62   : > { %2350 = vmatpush.bf16.msra.mxu2 %v2331_v43  ;;  %v1441_v28 = vpack.c.bf16 %v1436_v54, %v1435_v41  ;;  %v1214_v2 = vpack.c.bf16 %v1435_v41, %v1434_v51 }
  0x63   : > { %1112 = vmatmul.bf16.gmra.mxu0 %v1031_v12  ;;  %v1438_v10 = vld [vmem:[#allocation2 + $0x80] sm:$0xff] }
  0x64   : > { %1286 = vmatpush.bf16.msra.mxu1 %v2306_v19  ;;  %1628 = vmatpush.bf16.msra.mxu0 %v2330_v50  ;;  %v1442_v24 = vpack.c.bf16 %v1438_v10, %v1437_v6 }
  0x66   : > { %2351 = vmatpush.bf16.msra.mxu2 %v2330_v50 }
  0x68   : > { %1287 = vmatpush.bf16.msra.mxu1 %v2305_v39  ;;  %1629 = vmatpush.bf16.msra.mxu0 %v2329_v0 }
  0x6a   : > { %2352 = vmatpush.bf16.msra.mxu2 %v2329_v0 }
  0x6d   : > { %1402 = vmatmul.bf16.vlgmr.msrb.gmra.mxu2 %v1325_v8  ;;  %1516 = vmatmul.bf16.vlgmr.msrb.gmra.mxu3 %v1439_v23 }
  0x71   : > { %715 = vmatmul.bf16.gmra.mxu1 %v2871_v40  ;;  %v1327_v40 = vpack.c.bf16 %v2996_v11, %v2934_v60 }
  0x73   : > { %1117 = vmatmul.bf16.gmra.mxu0 %v1032_v52 }
  0x7d   : > { %1407 = vmatmul.bf16.gmra.mxu2 %v1326_v18  ;;  %1521 = vmatmul.bf16.gmra.mxu3 %v1440_v53 }
  0x81   : > { %720 = vmatmul.bf16.gmra.mxu1 %v2957_v63 }
  0x83   : > { %1122 = vmatmul.bf16.gmra.mxu0 %v1033_v56 }
  0x8d   : > { %1412 = vmatmul.bf16.gmra.mxu2 %v1327_v40  ;;  %1526 = vmatmul.bf16.gmra.mxu3 %v1441_v28 }
  0x91   : > { %1288 = vmatmul.bf16.vlgmr.msra.gmra.mxu1 %v1212_v59 }
  0x93   : > { %1630 = vmatmul.bf16.vlgmr.msra.gmra.mxu0 %v1553_v26 }
  0x9d   : > { %1417 = vmatmul.bf16.gmra.mxu2 %v1328_v5  ;;  %1531 = vmatmul.bf16.gmra.mxu3 %v1442_v24 }
  0xa1   : > { %1293 = vmatmul.bf16.gmra.mxu1 %v1213_v29 }
  0xa3   : > { %1635 = vmatmul.bf16.gmra.mxu0 %v1554_v35 }
  0xa8   : > { %v3042_v58 = vpop.f32.mrf.mxu1 }
  0xad   : > { %1645 = vmatmul.bf16.vlgmr.msra.gmra.mxu2 %v1556_v57 }
  0xb0   : > { %v812_v9 = vpop.f32.mrf.mxu2  ;;  %v629_v62 = vpop.f32.mrf.mxu0 }
  0xb1   : > { %1298 = vmatmul.bf16.gmra.mxu1 %v1214_v2  ;;  %v994_v1 = vpop.f32.mrf.mxu3  ;;  %v641_v3 = vpop.f32.mrf.mxu1 }
  0xb3   : > { %1640 = vmatmul.bf16.gmra.mxu0 %v1555_v55 }
  0xb8   : > { %v814_v60 = vpop.f32.mrf.mxu2  ;;  %v631_v49 = vpop.f32.mrf.mxu0 }
  0xb9   : > { %v996_v4 = vpop.f32.mrf.mxu3 }
  0xbe   : > { %v644_v63 = vpop.f32.mrf.mxu1 }
  0xc0   : > { %v817_v25 = vpop.f32.mrf.mxu2  ;;  %v634_v61 = vpop.f32.mrf.mxu0 }
  0xc1   : > { %1303 = vmatmul.bf16.gmra.mxu1 %v1215_v17  ;;  %v999_v34 = vpop.f32.mrf.mxu3 }
  0xc6   : > { %v646_v33 = vpop.f32.mrf.mxu1 }
  0xc8   : > { %v819_v30 = vpop.f32.mrf.mxu2  ;;  %v636_v36 = vpop.f32.mrf.mxu0 }
  0xc9   : > { %v3046_v7 = vpop.f32.mrf.mxu3 }
  0xce   : > { %v706_v42 = vpop.f32.mrf.mxu1 }
  0xcf   : > { %v707_v48 = vadd.f32 %v706_v42, %v629_v62 }
  0xd0   : > { %v3044_v31 = vpop.f32.mrf.mxu2  ;;  %v1108_v14 = vpop.f32.mrf.mxu0 }
  0xd1   : > { %v832_v46 = vadd.f32 %v812_v9, %v707_v48  ;;  %v3048_v11 = vpop.f32.mrf.mxu3 }
  0xd3   : > { %v1014_v55 = vadd.f32 %v994_v1, %v832_v46 }
  0xd5   : > { %v1128_v10 = vadd.f32 %v1108_v14, %v1014_v55 }
  0xd6   : > { %v708_v19 = vpop.f32.mrf.mxu1 }
  0xd7   : > { %v709_v32 = vadd.f32 %v708_v19, %v631_v49 }
  0xd8   : > { %v824_v8 = vpop.f32.mrf.mxu2  ;;  %v1110_v15 = vpop.f32.mrf.mxu0 }
  0xd9   : > { %v833_v37 = vadd.f32 %v814_v60, %v709_v32  ;;  %v3050_v38 = vpop.f32.mrf.mxu3 }
  0xdb   : > { %v1015_v60 = vadd.f32 %v996_v4, %v833_v37 }
  0xde   : > { %v711_v16 = vpop.f32.mrf.mxu1 }
  0xdf   : > { %v712_v23 = vadd.f32 %v711_v16, %v634_v61 }
  0xe0   : > { %v827_v12 = vpop.f32.mrf.mxu2  ;;  %v1113_v39 = vpop.f32.mrf.mxu0 }
  0xe1   : > { %v834_v13 = vadd.f32 %v817_v25, %v712_v23  ;;  %v3052_v21 = vpop.f32.mrf.mxu3  ;;  %v1129_v25 = vadd.f32 %v1110_v15, %v1015_v60 }
  0xe3   : > { %v1016_v61 = vadd.f32 %v999_v34, %v834_v13 }
  0xe5   : > { %v1130_v42 = vadd.f32 %v1113_v39, %v1016_v61 }
  0xe6   : > { %v713_v20 = vpop.f32.mrf.mxu1 }
  0xe7   : > { %v714_v45 = vadd.f32 %v713_v20, %v636_v36 }
  0xe8   : > { %v829_v43 = vpop.f32.mrf.mxu2  ;;  %v1115_v47 = vpop.f32.mrf.mxu0 }
  0xe9   : > { %v835_v44 = vadd.f32 %v819_v30, %v714_v45  ;;  %v3058_v51 = vpop.f32.mrf.mxu3 }
  0xeb   : > { %v1017_v19 = vadd.f32 %v3046_v7, %v835_v44 }
  0xed   : > { %v1131_v45 = vadd.f32 %v1115_v47, %v1017_v19 }
  0xee   : > { %v716_v50 = vpop.f32.mrf.mxu1 }
  0xef   : > { %v717_v32 = vadd.f32 %v716_v50, %v3042_v58 }
  0xf0   : > { %v1403_v22 = vpop.f32.mrf.mxu2  ;;  %v3054_v18 = vpop.f32.mrf.mxu0 }
  0xf1   : > { %v1517_v54 = vpop.f32.mrf.mxu3  ;;  %v836_v39 = vadd.f32 %v3044_v31, %v717_v32 }
  0xf3   : > { %v1018_v58 = vadd.f32 %v3048_v11, %v836_v39 }
  0xf6   : > { %v718_v0 = vpop.f32.mrf.mxu1 }
  0xf7   : > { %v719_v26 = vadd.f32 %v718_v0, %v641_v3 }
  0xf8   : > { %v1405_v52 = vpop.f32.mrf.mxu2  ;;  %v3060_v53 = vpop.f32.mrf.mxu0 }
  0xf9   : > { %v3056_v27 = vadd.f32 %v824_v8, %v719_v26  ;;  %v1519_v24 = vpop.f32.mrf.mxu3 }
  0xfb   : > { %v1019_v55 = vadd.f32 %v3050_v38, %v3056_v27 }
  0xfe   : > { %v721_v40 = vpop.f32.mrf.mxu1 }
  0xff   : > { %v722_v35 = vadd.f32 %v721_v40, %v644_v63 }
 0x100   : > { %v1408_v56 = vpop.f32.mrf.mxu2  ;;  %v3064_v28 = vpop.f32.mrf.mxu0 }
 0x101   : > { %v3062_v41 = vadd.f32 %v827_v12, %v722_v35  ;;  %v1522_v30 = vpop.f32.mrf.mxu3 }
 0x106   : > { %v723_v59 = vpop.f32.mrf.mxu1 }
 0x107   : > { %v724_v5 = vadd.f32 %v723_v59, %v646_v33 }
 0x108   : > { %v3068_v29 = vpop.f32.mrf.mxu0  ;;  %v1410_v2 = vpop.f32.mrf.mxu2 }
 0x109   : > { %v3066_v6 = vadd.f32 %v829_v43, %v724_v5  ;;  %v1524_v34 = vpop.f32.mrf.mxu3 }
 0x10e   : > { %v1289_v57 = vpop.f32.mrf.mxu1 }
 0x10f   : > { %v1309_v9 = vadd.f32 %v1289_v57, %v1128_v10 }
 0x110   : > { %v1631_v1 = vpop.f32.mrf.mxu0  ;;  %v1413_v36 = vpop.f32.mrf.mxu2 }
 0x111   : > { %v1423_v62 = vadd.f32 %v1403_v22, %v1309_v9  ;;  %v1527_v40 = vpop.f32.mrf.mxu3 }
 0x113   : > { %v1537_v3 = vadd.f32 %v1517_v54, %v1423_v62  ;;  %v1132_v54 = vadd.f32 %v3054_v18, %v1018_v58 }
 0x115   : > { %v1651_v17 = vadd.f32 %v1631_v1, %v1537_v3 }
 0x116   : > { %v1291_v49 = vpop.f32.mrf.mxu1 }
 0x117   : > { %v1310_v63 = vadd.f32 %v1291_v49, %v1129_v25  ;;  %1659 = vst [vmem:[%s3074_s24] sm:$0xff] %v1651_v17  ;;  %v1680_v37 = vmul.f32 %v1651_v17, %v1651_v17  ;;  %v1020_v49 = vadd.f32 %v3052_v21, %v3062_v41 }
 0x118   : > { %v1633_v48 = vpop.f32.mrf.mxu0  ;;  %v1415_v13 = vpop.f32.mrf.mxu2 }
 0x119   : > { %v1424_v33 = vadd.f32 %v1405_v52, %v1310_v63  ;;  %v1529_v60 = vpop.f32.mrf.mxu3  ;;  %v1134_v61 = vadd.f32 %v3064_v28, %v1020_v49 }
 0x11b   : > { %v1538_v4 = vadd.f32 %v1519_v24, %v1424_v33 }
 0x11d   : > { %v1652_v8 = vadd.f32 %v1633_v48, %v1538_v4  ;;  %v1021_v48 = vadd.f32 %v3058_v51, %v3066_v6 }
 0x11e   : > { %v1294_v46 = vpop.f32.mrf.mxu1 }
 0x11f   : > { %v1311_v14 = vadd.f32 %v1294_v46, %v1130_v42  ;;  %1660 = vst [vmem:[%s3074_s24 + $0x8] sm:$0xff] %v1652_v8  ;;  %v1667_v12 = vadd.f32 %v1652_v8, %v1651_v17  ;;  %v1681_v15 = vmul.f32 %v1652_v8, %v1652_v8  ;;  %v1135_v32 = vadd.f32 %v3068_v29, %v1021_v48 }
 0x120   : > { %v1636_v43 = vpop.f32.mrf.mxu0 }
 0x121   : > { %v1425_v16 = vadd.f32 %v1408_v56, %v1311_v14  ;;  %v1688_v23 = vadd.f32 %v1681_v15, %v1680_v37  ;;  %v1418_v56 = vpop.f32.mrf.mxu2  ;;  %v1532_v42 = vpop.f32.mrf.mxu3 }
 0x123   : > { %v1539_v20 = vadd.f32 %v1522_v30, %v1425_v16 }
 0x125   : > { %v1653_v0 = vadd.f32 %v1636_v43, %v1539_v20 }
 0x126   : > { %v1296_v22 = vpop.f32.mrf.mxu1 }
 0x127   : > { %v1312_v26 = vadd.f32 %v1296_v22, %v1131_v45  ;;  %1661 = vst [vmem:[%s3074_s24 + $0x10] sm:$0xff] %v1653_v0  ;;  %v1668_v7 = vadd.f32 %v1667_v12, %v1653_v0  ;;  %v1682_v44 = vmul.f32 %v1653_v0, %v1653_v0 }
 0x128   : > { %v1638_v47 = vpop.f32.mrf.mxu0 }
 0x129   : > { %v1426_v50 = vadd.f32 %v1410_v2, %v1312_v26  ;;  %v1689_v52 = vadd.f32 %v1688_v23, %v1682_v44  ;;  %v1133_v2 = vadd.f32 %v3060_v53, %v1019_v55  ;;  %v1420_v1 = vpop.f32.mrf.mxu2 }
 0x12b   : > { %v1540_v35 = vadd.f32 %v1524_v34, %v1426_v50 }
 0x12d   : > { %v1654_v31 = vadd.f32 %v1638_v47, %v1540_v35 }
 0x12e   : > { %v1299_v59 = vpop.f32.mrf.mxu1 }
 0x12f   : > { %v1313_v5 = vadd.f32 %v1299_v59, %v1132_v54  ;;  %1662 = vst [vmem:[%s3074_s24 + $0x18] sm:$0xff] %v1654_v31  ;;  %v1669_v11 = vadd.f32 %v1668_v7, %v1654_v31  ;;  %v1683_v10 = vmul.f32 %v1654_v31, %v1654_v31 }
 0x130   : > { %v1641_v62 = vpop.f32.mrf.mxu0 }
 0x131   : > { %v1427_v24 = vadd.f32 %v1413_v36, %v1313_v5  ;;  %v1690_v57 = vadd.f32 %v1689_v52, %v1683_v10  ;;  %v1646_v8 = vpop.f32.mrf.mxu2 }
 0x133   : > { %v1541_v9 = vadd.f32 %v1527_v40, %v1427_v24 }
 0x135   : > { %v1655_v3 = vadd.f32 %v1641_v62, %v1541_v9 }
 0x136   : > { %v1301_v18 = vpop.f32.mrf.mxu1 }
 0x137   : > { %v1314_v25 = vadd.f32 %v1301_v18, %v1133_v2  ;;  %1663 = vst [vmem:[%s3074_s24 + $0x20] sm:$0xff] %v1655_v3  ;;  %v1670_v38 = vadd.f32 %v1669_v11, %v1655_v3  ;;  %v1684_v27 = vmul.f32 %v1655_v3, %v1655_v3 }
 0x138   : > { %v1643_v33 = vpop.f32.mrf.mxu0 }
 0x139   : > { %v1428_v17 = vadd.f32 %v1415_v13, %v1314_v25  ;;  %v1691_v63 = vadd.f32 %v1690_v57, %v1684_v27  ;;  %v1534_v13 = vpop.f32.mrf.mxu3  ;;  %v1648_v6 = vpop.f32.mrf.mxu2 }
 0x13b   : > { %v1542_v30 = vadd.f32 %v1529_v60, %v1428_v17 }
 0x13d   : > { %v1656_v36 = vadd.f32 %v1643_v33, %v1542_v30 }
 0x13e   : > { %v1304_v53 = vpop.f32.mrf.mxu1 }
 0x13f   : > { %v1315_v4 = vadd.f32 %v1304_v53, %v1134_v61  ;;  %1664 = vst [vmem:[%s3074_s24 + $0x28] sm:$0xff] %v1656_v36  ;;  %v1671_v46 = vadd.f32 %v1670_v38, %v1656_v36  ;;  %v1685_v21 = vmul.f32 %v1656_v36, %v1656_v36 }
 0x141   : > { %v1429_v41 = vadd.f32 %v1418_v56, %v1315_v4  ;;  %v1692_v14 = vadd.f32 %v1691_v63, %v1685_v21 }
 0x143   : > { %v1543_v19 = vadd.f32 %v1532_v42, %v1429_v41 }
 0x145   : > { %v1657_v28 = vadd.f32 %v1646_v8, %v1543_v19 }
 0x146   : > { %v1306_v37 = vpop.f32.mrf.mxu1 }
 0x147   : > { %1665 = vst [vmem:[%s3074_s24 + $0x30] sm:$0xff] %v1657_v28  ;;  %v1672_v12 = vadd.f32 %v1671_v46, %v1657_v28  ;;  %v1686_v15 = vmul.f32 %v1657_v28, %v1657_v28  ;;  %v1316_v16 = vadd.f32 %v1306_v37, %v1135_v32 }
 0x149   : > { %v1693_v34 = vadd.f32 %v1692_v14, %v1686_v15  ;;  %v1430_v23 = vadd.f32 %v1420_v1, %v1316_v16 }
 0x14b   : > { %v1544_v51 = vadd.f32 %v1534_v13, %v1430_v23 }
 0x14d   : > { %v1658_v20 = vadd.f32 %v1648_v6, %v1544_v51 }
 0x14f   : > { %1666 = vst [vmem:[%s3074_s24 + $0x38] sm:$0xff] %v1658_v20  ;;  %v1673_v45 = vadd.f32 %v1672_v12, %v1658_v20  ;;  %v1687_v39 = vmul.f32 %v1658_v20, %v1658_v20 }
 0x151   : > { %v1674_v43 = vrot.slane %v1673_v45, 4  ;;  %v1694_v22 = vadd.f32 %v1693_v34, %v1687_v39 }
 0x153   : > { %v1675_v0 = vadd.f32 %v1674_v43, %v1673_v45  ;;  %v1695_v29 = vrot.slane %v1694_v22, 4 }
 0x155   : > { %v1676_v26 = vrot.slane %v1675_v0, 2  ;;  %v1696_v58 = vadd.f32 %v1695_v29, %v1694_v22 }
 0x157   : > { %v1677_v7 = vadd.f32 %v1676_v26, %v1675_v0  ;;  %v1697_v44 = vrot.slane %v1696_v58, 2 }
 0x159   : > { %v1678_v50 = vrot.slane %v1677_v7, 1  ;;  %v1698_v52 = vadd.f32 %v1697_v44, %v1696_v58 }
 0x15b   : > { %v1699_v40 = vrot.slane %v1698_v52, 1  ;;  %v1679_v35 = vadd.f32 %v1678_v50, %v1677_v7 }
 0x15d   : > { %v1700_v54 = vadd.f32 %v1699_v40, %v1698_v52 }
 0x15f   : > { %v1702_v56 = vsel %vm1701_vm0, %v1679_v35, %v1700_v54 }
 0x160   : > { %1703 = vst [vmem:[%s376_s9] sm:$0x3] %v1702_v56 }
 0x161 PF: > { %s19_s27 = sadd.s32 1, %s2376_s27  }
 0x162   : > { %p16_p4 = scmp.ge.s32.totalorder %s19_s27, 4  }
 0x164   :  { %18 = sbr.rel (!%p16_p4) target bundleno = 1 (0x1), region = 108 }

// kernel: bottleneck_forward.5
= control target key start
LH: loop header
LB: loop body
LE: loop exit
PB: predicated region body
PF: predicated region fallthrough
CT: control target
= control target key end

     0   :  { %s844_s4 = inlined_call_operand.vmem [shape: bf16[256,128], index: 4, kind: input, shape index: {}]   ;;  %s845_s0 = inlined_call_operand.vmem [shape: f32[128,128], index: 0, kind: input, shape index: {}]   ;;  %s846_s2 = inlined_call_operand.vmem [shape: f32[1,128], index: 2, kind: input, shape index: {}]   ;;  %s847_s3 = inlined_call_operand.vmem [shape: f32[1,128], index: 3, kind: input, shape index: {}]   ;;  %s848_s1 = inlined_call_operand.vmem [shape: f32[128,128], index: 1, kind: input, shape index: {}]   ;;  %s849_s5 = inlined_call_operand.vmem [shape: f32[128,128], index: 5, kind: output, shape index: {}]  }
   0x1   :  { %v553_v0 = vld [vmem:[%s844_s4 + $0x38] sm:$0xff]  ;;  %v552_v2 = vld [vmem:[%s844_s4 + $0x30] sm:$0xff]  ;;  %v551_v4 = vld [vmem:[%s844_s4 + $0x28] sm:$0xff] }
   0x2   :  { %v561_v1 = vld [vmem:[%s844_s4 + $0x78] sm:$0xff]  ;;  %364 = vmatpush.bf16.msra.mxu0 %v553_v0  ;;  %562 = vmatpush.bf16.msra.mxu2 %v553_v0  ;;  %v560_v3 = vld [vmem:[%s844_s4 + $0x70] sm:$0xff]  ;;  %v20_v5 = vld [vmem:[%s845_s0] sm:$0xff] }
   0x3   :  { %413 = vmatpush.bf16.msra.mxu1 %v561_v1  ;;  %570 = vmatpush.bf16.msra.mxu3 %v561_v1  ;;  %v21_v6 = vld [vmem:[%s845_s0 + $0x8] sm:$0xff]  ;;  %v634_v7 = vld [vmem:[%s846_s2] ss:$0 sm:$0xff]  ;;  %v549_v22 = vld [vmem:[%s844_s4 + $0x18] sm:$0xff] }
   0x4   :  { %v559_v8 = vld [vmem:[%s844_s4 + $0x68] sm:$0xff]  ;;  %v28_v9 = vld [vmem:[%s845_s0 + $0x40] sm:$0xff]  ;;  %v40_v11 = vmul.f32 %v634_v7, %v20_v5  ;;  %v41_v12 = vmul.f32 %v634_v7, %v21_v6  ;;  %v557_v23 = vld [vmem:[%s844_s4 + $0x58] sm:$0xff] }
   0x5   :  { %v29_v10 = vld [vmem:[%s845_s0 + $0x48] sm:$0xff]  ;;  %v650_v13 = vld [vmem:[%s847_s3] ss:$0 sm:$0xff]  ;;  %v48_v14 = vmul.f32 %v634_v7, %v28_v9  ;;  %v548_v28 = vld [vmem:[%s844_s4 + $0x10] sm:$0xff] }
   0x6   :  { %365 = vmatpush.bf16.msra.mxu0 %v552_v2  ;;  %563 = vmatpush.bf16.msra.mxu2 %v552_v2  ;;  %v49_v15 = vmul.f32 %v634_v7, %v29_v10  ;;  %v550_v16 = vld [vmem:[%s844_s4 + $0x20] sm:$0xff]  ;;  %v60_v18 = vadd.f32 %v650_v13, %v40_v11  ;;  %v61_v19 = vadd.f32 %v650_v13, %v41_v12  ;;  %v556_v29 = vld [vmem:[%s844_s4 + $0x50] sm:$0xff]  ;;  %v109_v31 = vld [vmem:[%s848_s1 + $0x8] sm:$0xff] }
   0x7   :  { %414 = vmatpush.bf16.msra.mxu1 %v560_v3  ;;  %571 = vmatpush.bf16.msra.mxu3 %v560_v3  ;;  %v558_v17 = vld [vmem:[%s844_s4 + $0x60] sm:$0xff]  ;;  %v68_v20 = vadd.f32 %v650_v13, %v48_v14  ;;  %v117_v33 = vld [vmem:[%s848_s1 + $0x48] sm:$0xff]  ;;  %v22_v39 = vld [vmem:[%s845_s0 + $0x10] sm:$0xff]  ;;  %v125_v42 = vpack.c.bf16 %v109_v31, %v109_v31 }
   0x8   :  { %v69_v21 = vadd.f32 %v650_v13, %v49_v15  ;;  %v76_v24 = vmax.f32 %v60_v18, 0.0  ;;  %v77_v25 = vmax.f32 %v61_v19, 0.0  ;;  %v108_v30 = vld [vmem:[%s848_s1] sm:$0xff]  ;;  %v23_v40 = vld [vmem:[%s845_s0 + $0x18] sm:$0xff]  ;;  %v547_v41 = vld [vmem:[%s844_s4 + $0x8] sm:$0xff]  ;;  %v133_v44 = vpack.c.bf16 %v117_v33, %v117_v33 }
   0x9   :  { %v84_v26 = vmax.f32 %v68_v20, 0.0  ;;  %v116_v32 = vld [vmem:[%s848_s1 + $0x40] sm:$0xff]  ;;  %v124_v38 = vpack.c.bf16 %v108_v30, %v108_v30  ;;  %v30_v45 = vld [vmem:[%s845_s0 + $0x50] sm:$0xff]  ;;  %v31_v46 = vld [vmem:[%s845_s0 + $0x58] sm:$0xff]  ;;  %v42_v50 = vmul.f32 %v634_v7, %v22_v39  ;;  %v43_v51 = vmul.f32 %v634_v7, %v23_v40 }
   0xa   :  { %366 = vmatpush.bf16.msra.mxu0 %v551_v4  ;;  %564 = vmatpush.bf16.msra.mxu2 %v551_v4  ;;  %v85_v27 = vmax.f32 %v69_v21, 0.0  ;;  %v92_v34 = vpack.c.bf16 %v76_v24, %v76_v24  ;;  %v93_v35 = vpack.c.bf16 %v77_v25, %v77_v25  ;;  %v132_v43 = vpack.c.bf16 %v116_v32, %v116_v32  ;;  %v555_v47 = vld [vmem:[%s844_s4 + $0x48] sm:$0xff]  ;;  %v546_v56 = vld [vmem:[%s844_s4] sm:$0xff]  ;;  %v110_v11 = vld [vmem:[%s848_s1 + $0x10] sm:$0xff] }
   0xb   :  { %415 = vmatpush.bf16.msra.mxu1 %v559_v8  ;;  %572 = vmatpush.bf16.msra.mxu3 %v559_v8  ;;  %v100_v36 = vpack.c.bf16 %v84_v26, %v84_v26  ;;  %v50_v54 = vmul.f32 %v634_v7, %v30_v45  ;;  %v51_v55 = vmul.f32 %v634_v7, %v31_v46  ;;  %v204_v57 = vunpack.c.l.b16 %v124_v38  ;;  %v554_v61 = vld [vmem:[%s844_s4 + $0x40] sm:$0xff]  ;;  %v111_v12 = vld [vmem:[%s848_s1 + $0x18] sm:$0xff]  ;;  %v118_v14 = vld [vmem:[%s848_s1 + $0x50] sm:$0xff] }
   0xc   :  { %v101_v37 = vpack.c.bf16 %v85_v27, %v85_v27  ;;  %v156_v48 = vunpack.c.l.b16 %v92_v34  ;;  %v157_v49 = vunpack.c.l.b16 %v93_v35  ;;  %v205_v58 = vunpack.c.l.b16 %v125_v42  ;;  %v119_v15 = vld [vmem:[%s848_s1 + $0x58] sm:$0xff]  ;;  %v25_v21 = vld [vmem:[%s845_s0 + $0x28] sm:$0xff] }
   0xd   :  { %v164_v52 = vunpack.c.l.b16 %v100_v36  ;;  %v212_v59 = vunpack.c.l.b16 %v132_v43  ;;  %v213_v60 = vunpack.c.l.b16 %v133_v44  ;;  %v62_v62 = vadd.f32 %v650_v13, %v42_v50 }
   0xe   :  { %367 = vmatpush.bf16.msra.mxu0 %v550_v16  ;;  %565 = vmatpush.bf16.msra.mxu2 %v550_v16  ;;  %v165_v53 = vunpack.c.l.b16 %v101_v37  ;;  %v63_v63 = vadd.f32 %v650_v13, %v43_v51  ;;  %v172_v0 = vpack.c.b16 %v157_v49, %v156_v48  ;;  %v70_v2 = vadd.f32 %v650_v13, %v50_v54  ;;  %v24_v16 = vld [vmem:[%s845_s0 + $0x20] sm:$0xff] }
   0xf   :  { %416 = vmatpush.bf16.msra.mxu1 %v558_v17  ;;  %573 = vmatpush.bf16.msra.mxu3 %v558_v17  ;;  %v71_v3 = vadd.f32 %v650_v13, %v51_v55  ;;  %v220_v4 = vpack.c.b16 %v205_v58, %v204_v57  ;;  %v224_v5 = vpack.c.b16 %v213_v60, %v212_v59  ;;  %v78_v6 = vmax.f32 %v62_v62, 0.0  ;;  %v120_v54 = vld [vmem:[%s848_s1 + $0x60] sm:$0xff]  ;;  %v121_v55 = vld [vmem:[%s848_s1 + $0x68] sm:$0xff]  ;;  %v26_v60 = vld [vmem:[%s845_s0 + $0x30] sm:$0xff] }
  0x10   :  { %v176_v1 = vpack.c.b16 %v165_v53, %v164_v52  ;;  %v79_v8 = vmax.f32 %v63_v63, 0.0  ;;  %v86_v9 = vmax.f32 %v70_v2, 0.0  ;;  %v126_v24 = vpack.c.bf16 %v110_v11, %v110_v11  ;;  %v112_v52 = vld [vmem:[%s848_s1 + $0x20] sm:$0xff]  ;;  %v113_v53 = vld [vmem:[%s848_s1 + $0x28] sm:$0xff]  ;;  %v34_v2 = vld [vmem:[%s845_s0 + $0x70] sm:$0xff] }
  0x11   :  { %v87_v10 = vmax.f32 %v71_v3, 0.0  ;;  %v94_v17 = vpack.c.bf16 %v78_v6, %v78_v6  ;;  %v127_v25 = vpack.c.bf16 %v111_v12, %v111_v12  ;;  %v134_v26 = vpack.c.bf16 %v118_v14, %v118_v14  ;;  %v35_v3 = vld [vmem:[%s845_s0 + $0x78] sm:$0xff] }
  0x12   :  { %368 = vmatpush.bf16.msra.mxu0 %v549_v22  ;;  %566 = vmatpush.bf16.msra.mxu2 %v549_v22  ;;  %v95_v18 = vpack.c.bf16 %v79_v8, %v79_v8  ;;  %v102_v19 = vpack.c.bf16 %v86_v9, %v86_v9  ;;  %v32_v22 = vld [vmem:[%s845_s0 + $0x60] sm:$0xff]  ;;  %v135_v27 = vpack.c.bf16 %v119_v15, %v119_v15  ;;  %v206_v36 = vunpack.c.l.b16 %v126_v24 }
  0x13   :  { %417 = vmatpush.bf16.msra.mxu1 %v557_v23  ;;  %574 = vmatpush.bf16.msra.mxu3 %v557_v23  ;;  %v103_v20 = vpack.c.bf16 %v87_v10, %v87_v10  ;;  %v33_v23 = vld [vmem:[%s845_s0 + $0x68] sm:$0xff]  ;;  %v52_v30 = vmul.f32 %v634_v7, %v32_v22  ;;  %v158_v32 = vunpack.c.l.b16 %v94_v17  ;;  %v207_v37 = vunpack.c.l.b16 %v127_v25 }
  0x14   :  { %v53_v31 = vmul.f32 %v634_v7, %v33_v23  ;;  %v159_v33 = vunpack.c.l.b16 %v95_v18  ;;  %v166_v34 = vunpack.c.l.b16 %v102_v19  ;;  %v214_v38 = vunpack.c.l.b16 %v134_v26 }
  0x15   :  { %v167_v35 = vunpack.c.l.b16 %v103_v20  ;;  %v215_v39 = vunpack.c.l.b16 %v135_v27  ;;  %v72_v42 = vadd.f32 %v650_v13, %v52_v30  ;;  %v221_v46 = vpack.c.b16 %v207_v37, %v206_v36  ;;  %v115_v30 = vld [vmem:[%s848_s1 + $0x38] sm:$0xff] }
  0x16   :  { %369 = vmatpush.bf16.msra.mxu0 %v548_v28  ;;  %567 = vmatpush.bf16.msra.mxu2 %v548_v28  ;;  %v44_v28 = vmul.f32 %v634_v7, %v24_v16  ;;  %v73_v43 = vadd.f32 %v650_v13, %v53_v31  ;;  %v173_v44 = vpack.c.b16 %v159_v33, %v158_v32  ;;  %v123_v31 = vld [vmem:[%s848_s1 + $0x78] sm:$0xff] }
  0x17   :  { %418 = vmatpush.bf16.msra.mxu1 %v556_v29  ;;  %575 = vmatpush.bf16.msra.mxu3 %v556_v29  ;;  %v45_v29 = vmul.f32 %v634_v7, %v25_v21  ;;  %v177_v45 = vpack.c.b16 %v167_v35, %v166_v34  ;;  %v88_v50 = vmax.f32 %v72_v42, 0.0  ;;  %v129_v62 = vpack.c.bf16 %v113_v53, %v113_v53 }
  0x18   :  { %v64_v40 = vadd.f32 %v650_v13, %v44_v28  ;;  %v89_v51 = vmax.f32 %v73_v43, 0.0  ;;  %v136_v63 = vpack.c.bf16 %v120_v54, %v120_v54  ;;  %v46_v9 = vmul.f32 %v634_v7, %v26_v60 }
  0x19   :  { %v104_v58 = vpack.c.bf16 %v88_v50, %v88_v50  ;;  %v54_v11 = vmul.f32 %v634_v7, %v34_v2  ;;  %v55_v12 = vmul.f32 %v634_v7, %v35_v3  ;;  %v209_v15 = vunpack.c.l.b16 %v129_v62 }
  0x1a   :  { %370 = vmatpush.bf16.msra.mxu0 %v547_v41  ;;  %568 = vmatpush.bf16.msra.mxu2 %v547_v41  ;;  %v65_v41 = vadd.f32 %v650_v13, %v45_v29  ;;  %v80_v48 = vmax.f32 %v64_v40, 0.0  ;;  %v105_v59 = vpack.c.bf16 %v89_v51, %v89_v51  ;;  %v216_v16 = vunpack.c.l.b16 %v136_v63  ;;  %v114_v29 = vld [vmem:[%s848_s1 + $0x30] sm:$0xff] }
  0x1b   :  { %419 = vmatpush.bf16.msra.mxu1 %v555_v47  ;;  %576 = vmatpush.bf16.msra.mxu3 %v555_v47  ;;  %v225_v47 = vpack.c.b16 %v215_v39, %v214_v38  ;;  %v168_v6 = vunpack.c.l.b16 %v104_v58  ;;  %v66_v20 = vadd.f32 %v650_v13, %v46_v9  ;;  %v74_v22 = vadd.f32 %v650_v13, %v54_v11 }
  0x1c   :  { %v81_v49 = vmax.f32 %v65_v41, 0.0  ;;  %v169_v8 = vunpack.c.l.b16 %v105_v59  ;;  %v75_v23 = vadd.f32 %v650_v13, %v55_v12  ;;  %v130_v36 = vpack.c.bf16 %v114_v29, %v114_v29 }
  0x1d   :  { %v82_v26 = vmax.f32 %v66_v20, 0.0  ;;  %v90_v27 = vmax.f32 %v74_v22, 0.0  ;;  %v131_v37 = vpack.c.bf16 %v115_v30, %v115_v30  ;;  %v139_v39 = vpack.c.bf16 %v123_v31, %v123_v31 }
  0x1e   :  { %371 = vmatpush.bf16.msra.mxu0 %v546_v56  ;;  %569 = vmatpush.bf16.msra.mxu2 %v546_v56  ;;  %v96_v56 = vpack.c.bf16 %v80_v48, %v80_v48  ;;  %v97_v57 = vpack.c.bf16 %v81_v49, %v81_v49  ;;  %v178_v19 = vpack.c.b16 %v169_v8, %v168_v6  ;;  %v91_v28 = vmax.f32 %v75_v23, 0.0 }
  0x1f   :  { %420 = vmatpush.bf16.msra.mxu1 %v554_v61  ;;  %577 = vmatpush.bf16.msra.mxu3 %v554_v61  ;;  %v128_v61 = vpack.c.bf16 %v112_v52, %v112_v52  ;;  %v98_v32 = vpack.c.bf16 %v82_v26, %v82_v26  ;;  %v106_v34 = vpack.c.bf16 %v90_v27, %v90_v27 }
  0x20   :  { %v107_v35 = vpack.c.bf16 %v91_v28, %v91_v28 }
  0x21   :  { %372 = vmatmul.bf16.vlgmr.msra.gmra.mxu0 %v172_v0  ;;  %392 = vmatmul.bf16.vlgmr.msra.gmra.mxu2 %v176_v1  ;;  %v137_v0 = vpack.c.bf16 %v121_v55, %v121_v55  ;;  %v27_v1 = vld [vmem:[%s845_s0 + $0x38] sm:$0xff]  ;;  %v208_v14 = vunpack.c.l.b16 %v128_v61  ;;  %v162_v40 = vunpack.c.l.b16 %v98_v32  ;;  %v170_v42 = vunpack.c.l.b16 %v106_v34 }
  0x22   :  { %421 = vmatmul.bf16.vlgmr.msra.gmra.mxu1 %v220_v4  ;;  %441 = vmatmul.bf16.vlgmr.msra.gmra.mxu3 %v224_v5  ;;  %v160_v4 = vunpack.c.l.b16 %v96_v56  ;;  %v161_v5 = vunpack.c.l.b16 %v97_v57  ;;  %v47_v10 = vmul.f32 %v634_v7, %v27_v1  ;;  %v171_v43 = vunpack.c.l.b16 %v107_v35 }
  0x23   :  { %v217_v17 = vunpack.c.l.b16 %v137_v0  ;;  %v222_v24 = vpack.c.b16 %v209_v15, %v208_v14 }
  0x24   :  { %v174_v18 = vpack.c.b16 %v161_v5, %v160_v4  ;;  %v67_v21 = vadd.f32 %v650_v13, %v47_v10  ;;  %v122_v13 = vld [vmem:[%s848_s1 + $0x70] sm:$0xff]  ;;  %v179_v49 = vpack.c.b16 %v171_v43, %v170_v42 }
  0x25   :  { %v226_v25 = vpack.c.b16 %v217_v17, %v216_v16  ;;  %v138_v38 = vpack.c.bf16 %v122_v13, %v122_v13 }
  0x26   :  { %v83_v7 = vmax.f32 %v67_v21, 0.0 }
  0x28   :  { %v99_v33 = vpack.c.bf16 %v83_v7, %v83_v7 }
  0x2a   :  { %v163_v41 = vunpack.c.l.b16 %v99_v33 }
  0x2c   :  { %v175_v48 = vpack.c.b16 %v163_v41, %v162_v40 }
  0x31   :  { %377 = vmatmul.bf16.gmra.mxu0 %v173_v44  ;;  %397 = vmatmul.bf16.gmra.mxu2 %v177_v45  ;;  %v210_v44 = vunpack.c.l.b16 %v130_v36  ;;  %v211_v45 = vunpack.c.l.b16 %v131_v37 }
  0x32   :  { %426 = vmatmul.bf16.gmra.mxu1 %v221_v46  ;;  %446 = vmatmul.bf16.gmra.mxu3 %v225_v47  ;;  %v218_v46 = vunpack.c.l.b16 %v138_v38  ;;  %v219_v47 = vunpack.c.l.b16 %v139_v39 }
  0x33   :  { %v223_v50 = vpack.c.b16 %v211_v45, %v210_v44 }
  0x34   :  { %v227_v51 = vpack.c.b16 %v219_v47, %v218_v46 }
  0x41   :  { %382 = vmatmul.bf16.gmra.mxu0 %v174_v18  ;;  %402 = vmatmul.bf16.gmra.mxu2 %v178_v19 }
  0x42   :  { %431 = vmatmul.bf16.gmra.mxu1 %v222_v24  ;;  %451 = vmatmul.bf16.gmra.mxu3 %v226_v25 }
  0x51   :  { %387 = vmatmul.bf16.gmra.mxu0 %v175_v48  ;;  %407 = vmatmul.bf16.gmra.mxu2 %v179_v49 }
  0x52   :  { %436 = vmatmul.bf16.gmra.mxu1 %v223_v50  ;;  %456 = vmatmul.bf16.gmra.mxu3 %v227_v51 }
  0x9e   :  { %v373_v52 = vpop.f32.mrf.mxu0 }
  0x9f   :  { %v422_v53 = vpop.f32.mrf.mxu1 }
  0xa0   :  { %v423_v54 = vadd.f32 %v422_v53, %v373_v52 }
  0xa2   :  { %462 = vst [vmem:[%s849_s5] sm:$0xff] %v423_v54 }
  0xa4   :  { %v393_v55 = vpop.f32.mrf.mxu2 }
  0xa5   :  { %v442_v56 = vpop.f32.mrf.mxu3 }
  0xa6   :  { %v443_v57 = vadd.f32 %v442_v56, %v393_v55  ;;  %v375_v58 = vpop.f32.mrf.mxu0 }
  0xa7   :  { %v424_v59 = vpop.f32.mrf.mxu1 }
  0xa8   :  { %470 = vst [vmem:[%s849_s5 + $0x40] sm:$0xff] %v443_v57  ;;  %v425_v60 = vadd.f32 %v424_v59, %v375_v58 }
  0xaa   :  { %463 = vst [vmem:[%s849_s5 + $0x8] sm:$0xff] %v425_v60 }
  0xac   :  { %v395_v61 = vpop.f32.mrf.mxu2 }
  0xad   :  { %v444_v62 = vpop.f32.mrf.mxu3 }
  0xae   :  { %v445_v63 = vadd.f32 %v444_v62, %v395_v61  ;;  %v378_v0 = vpop.f32.mrf.mxu0 }
  0xaf   :  { %v427_v1 = vpop.f32.mrf.mxu1 }
  0xb0   :  { %471 = vst [vmem:[%s849_s5 + $0x48] sm:$0xff] %v445_v63  ;;  %v428_v2 = vadd.f32 %v427_v1, %v378_v0 }
  0xb2   :  { %464 = vst [vmem:[%s849_s5 + $0x10] sm:$0xff] %v428_v2 }
  0xb4   :  { %v398_v3 = vpop.f32.mrf.mxu2 }
  0xb5   :  { %v447_v4 = vpop.f32.mrf.mxu3 }
  0xb6   :  { %v448_v5 = vadd.f32 %v447_v4, %v398_v3  ;;  %v380_v6 = vpop.f32.mrf.mxu0 }
  0xb7   :  { %v429_v8 = vpop.f32.mrf.mxu1 }
  0xb8   :  { %472 = vst [vmem:[%s849_s5 + $0x50] sm:$0xff] %v448_v5  ;;  %v430_v9 = vadd.f32 %v429_v8, %v380_v6 }
  0xba   :  { %465 = vst [vmem:[%s849_s5 + $0x18] sm:$0xff] %v430_v9 }
  0xbc   :  { %v400_v10 = vpop.f32.mrf.mxu2 }
  0xbd   :  { %v449_v11 = vpop.f32.mrf.mxu3 }
  0xbe   :  { %v450_v12 = vadd.f32 %v449_v11, %v400_v10  ;;  %v383_v14 = vpop.f32.mrf.mxu0 }
  0xbf   :  { %v432_v15 = vpop.f32.mrf.mxu1 }
  0xc0   :  { %473 = vst [vmem:[%s849_s5 + $0x58] sm:$0xff] %v450_v12  ;;  %v433_v16 = vadd.f32 %v432_v15, %v383_v14 }
  0xc2   :  { %466 = vst [vmem:[%s849_s5 + $0x20] sm:$0xff] %v433_v16 }
  0xc4   :  { %v403_v17 = vpop.f32.mrf.mxu2 }
  0xc5   :  { %v452_v18 = vpop.f32.mrf.mxu3 }
  0xc6   :  { %v453_v19 = vadd.f32 %v452_v18, %v403_v17  ;;  %v385_v20 = vpop.f32.mrf.mxu0 }
  0xc7   :  { %v434_v21 = vpop.f32.mrf.mxu1 }
  0xc8   :  { %474 = vst [vmem:[%s849_s5 + $0x60] sm:$0xff] %v453_v19  ;;  %v435_v22 = vadd.f32 %v434_v21, %v385_v20 }
  0xca   :  { %467 = vst [vmem:[%s849_s5 + $0x28] sm:$0xff] %v435_v22 }
  0xcc   :  { %v405_v23 = vpop.f32.mrf.mxu2 }
  0xcd   :  { %v454_v24 = vpop.f32.mrf.mxu3 }
  0xce   :  { %v455_v25 = vadd.f32 %v454_v24, %v405_v23  ;;  %v388_v26 = vpop.f32.mrf.mxu0 }
  0xcf   :  { %v437_v7 = vpop.f32.mrf.mxu1 }
  0xd0   :  { %475 = vst [vmem:[%s849_s5 + $0x68] sm:$0xff] %v455_v25  ;;  %v438_v27 = vadd.f32 %v437_v7, %v388_v26 }
  0xd2   :  { %468 = vst [vmem:[%s849_s5 + $0x30] sm:$0xff] %v438_v27 }
  0xd4   :  { %v408_v28 = vpop.f32.mrf.mxu2 }
  0xd5   :  { %v457_v29 = vpop.f32.mrf.mxu3 }
  0xd6   :  { %v458_v30 = vadd.f32 %v457_v29, %v408_v28  ;;  %v390_v13 = vpop.f32.mrf.mxu0 }
  0xd7   :  { %v439_v31 = vpop.f32.mrf.mxu1 }
  0xd8   :  { %476 = vst [vmem:[%s849_s5 + $0x70] sm:$0xff] %v458_v30  ;;  %v440_v32 = vadd.f32 %v439_v31, %v390_v13 }
  0xda   :  { %469 = vst [vmem:[%s849_s5 + $0x38] sm:$0xff] %v440_v32 }
  0xdc   :  { %v410_v33 = vpop.f32.mrf.mxu2 }
  0xdd   :  { %v459_v34 = vpop.f32.mrf.mxu3 }
  0xde   :  { %v460_v35 = vadd.f32 %v459_v34, %v410_v33 }
  0xe0   :  { %477 = vst [vmem:[%s849_s5 + $0x78] sm:$0xff] %v460_v35 }

</bundles_post_ra>
